<compile_context>
chip_gen: v7x
topology: tpu7x:2x2x1
jax: 0.10.0
libtpu: 0.0.40
codegen_flags: <defaults>
</compile_context>

<pallas_src>
import math

import jax
import jax.numpy as jnp
import numpy as np
from jax.experimental import pallas as pl
from jax.experimental.pallas import tpu as pltpu


def upsample_kernel(x_ref, m1_ref, b1_ref, m2_ref, b2_ref,
                    m3_ref, m4_ref, b34_ref, out_ref):
    """One batch block per grid step; 4 MXU matmuls total.

    x_ref   : (NB, C*Sin)        flattened inputs (batch on sublanes)
    m1_ref  : (C*Sin, B*Sin)     conv1 operator   kron(W1, I)
    b1_ref  : (1, B*Sin)         conv1 bias, vec layout
    m2_ref  : (B*Sin, B*S2)      conv2 operator   sum_k kron(W2_k, T2_k)
    b2_ref  : (1, B*S2)          conv2 bias, vec layout
    m3_ref  : (B*S2, Dout_pad)   conv3 + output-placement operator, lane-padded
    m4_ref  : (C*Sin, Dout_pad)  conv4 + stride-2-placement operator, lane-padded
    b34_ref : (1, Dout_pad)      conv3 bias + conv4 bias, lane-padded
    out_ref : (NB, Dout_pad)     output block, stored exactly once, lane-dense
    """
    f32 = jnp.float32
    x = x_ref[...]                                                   # (NB, C*Sin)

    # conv1 (1x1) + ReLU
    h1 = jnp.maximum(
        jnp.dot(x, m1_ref[...], preferred_element_type=f32) + b1_ref[...], 0.0)

    # conv2 (3x3, output_padding=1) + ReLU — one fused matmul
    r2 = jnp.maximum(
        jnp.dot(h1, m2_ref[...], preferred_element_type=f32) + b2_ref[...], 0.0)

    # conv3 (+ output_padding=2 placement) and conv4 (+ stride-2 placement),
    # combined bias, final ReLU, single lane-dense store.
    y = (jnp.dot(r2, m3_ref[...], preferred_element_type=f32)
         + jnp.dot(x, m4_ref[...], preferred_element_type=f32)
         + b34_ref[...])
    out_ref[...] = jnp.maximum(y, 0.0)


def _selection_matrices(H, W, K):
    """Constant 0/1 spatial matrices (shape-only; built once at trace time)."""
    Ho2, Wo2 = H + K - 1, W + K - 1            # conv2 core output (8, 8)
    Hz, Wz = Ho2 + 1, Wo2 + 1                  # + output_padding=1 (9, 9)
    Hout, Wout = 2 * H - 1, 2 * W - 1          # final output (11, 11)

    # conv2: tap-k window selection, h1 grid (H,W) -> conv2 output grid (Hz,Wz).
    t2 = np.zeros((K * K, H * W, Hz * Wz), np.float32)
    for ky in range(K):
        for kx in range(K):
            k = ky * K + kx
            for yo in range(Ho2):
                for xo in range(Wo2):
                    yi, xi = yo + ky - (K - 1), xo + kx - (K - 1)
                    if 0 <= yi < H and 0 <= xi < W:
                        t2[k, yi * W + xi, yo * Wz + xo] = 1.0

    # conv3: place the (Hz,Wz) block at the top-left of (Hout,Wout); the
    # output_padding=2 border columns stay zero (bias only).
    p3 = np.zeros((Hz * Wz, Hout * Wout), np.float32)
    for yo in range(Hz):
        for xo in range(Wz):
            p3[yo * Wz + xo, yo * Wout + xo] = 1.0

    # conv4 (stride 2): scatter input pixels to even output positions.
    p4 = np.zeros((H * W, Hout * Wout), np.float32)
    for yi in range(H):
        for xi in range(W):
            p4[yi * W + xi, (2 * yi) * Wout + 2 * xi] = 1.0

    return t2, p3, p4


def upsample_forward(x_nchw, params, *, max_batch_block=256):
    (w1, b1), (w2, b2), (w3, b3), (w4, b4) = params
    N, C, H, W = x_nchw.shape
    assert 2 * H - 1 == H + 5 and 2 * W - 1 == W + 5, (
        "the module's two branch shapes only agree for 6x6 spatial inputs")
    B = w1.shape[1]
    O = w3.shape[1]
    K = w2.shape[2]
    Hz, Wz = H + K, W + K                       # conv2 output incl. padding (9, 9)
    Hout, Wout = 2 * H - 1, 2 * W - 1
    S_in, S2, S_out = H * W, Hz * Wz, Hout * Wout
    D_in, D_m1, D_m2, D_out = C * S_in, B * S_in, B * S2, O * S_out
    D_out_pad = ((D_out + 127) // 128) * 128    # lane-dense output width
    f32 = jnp.float32

    # ---- constant fused operators (built once, folded into the jit) --------
    t2_np, p3_np, p4_np = _selection_matrices(H, W, K)
    t2 = jnp.asarray(t2_np)                     # (K*K, S_in, S2)
    p3 = jnp.asarray(p3_np)                     # (S2, S_out)
    p4 = jnp.asarray(p4_np)                     # (S_in, S_out)

    # ConvTranspose2d weights are (Cin, Cout, kH, kW).
    w1m = w1[:, :, 0, 0].astype(f32)            # (C, B)
    w3m = w3[:, :, 0, 0].astype(f32)            # (B, O)
    w4m = w4[:, :, 0, 0].astype(f32)            # (C, O)
    # per-tap (Cin, Cout) weights, spatially flipped; tap k = ky*K + kx
    w2f = jnp.transpose(w2[:, :, ::-1, ::-1].astype(f32),
                        (2, 3, 0, 1)).reshape(K * K, B, B)

    m1 = jnp.kron(w1m, jnp.eye(S_in, dtype=f32))                    # (D_in, D_m1)
    m2 = jnp.einsum('kab,kst->asbt', w2f, t2).reshape(D_m1, D_m2)   # (D_m1, D_m2)
    m3 = jnp.kron(w3m, p3)                                          # (D_m2, D_out)
    m4 = jnp.kron(w4m, p4)                                          # (D_in, D_out)

    pad = D_out_pad - D_out
    m3 = jnp.pad(m3, ((0, 0), (0, pad)))
    m4 = jnp.pad(m4, ((0, 0), (0, pad)))

    b1v = jnp.broadcast_to(b1.astype(f32)[:, None], (B, S_in)).reshape(1, D_m1)
    b2v = jnp.broadcast_to(b2.astype(f32)[:, None], (B, S2)).reshape(1, D_m2)
    b34v = jnp.pad(
        jnp.broadcast_to((b3 + b4).astype(f32)[:, None], (O, S_out)).reshape(1, D_out),
        ((0, 0), (0, pad)))

    # ---- batch blocking: whole batch in one step for small N ----------------
    NB = N if N <= max_batch_block else max_batch_block
    n_blocks = -(-N // NB)
    N_pad = n_blocks * NB

    # NCHW -> (N, C*H*W): pure reshape, no transpose.
    x_flat = x_nchw.reshape(N, D_in).astype(f32)
    if N_pad != N:
        x_flat = jnp.pad(x_flat, ((0, N_pad - N), (0, 0)))

    def const_spec(a):
        return pl.BlockSpec(a.shape, lambda n: (0, 0))

    out = pl.pallas_call(
        upsample_kernel,
        out_shape=jax.ShapeDtypeStruct((N_pad, D_out_pad), f32),
        grid=(n_blocks,),
        in_specs=[
            pl.BlockSpec((NB, D_in), lambda n: (n, 0)),
            const_spec(m1), const_spec(b1v),
            const_spec(m2), const_spec(b2v),
            const_spec(m3), const_spec(m4), const_spec(b34v),
        ],
        out_specs=pl.BlockSpec((NB, D_out_pad), lambda n: (n, 0)),
        compiler_params=pltpu.CompilerParams(
            dimension_semantics=("parallel",)),
    )(x_flat, m1, b1v, m2, b2v, m3, m4, b34v)

    # strip batch/lane padding, restore NCHW
    return out[:N, :D_out].reshape(N, O, Hout, Wout)


# ---------------- pure-JAX reference (for correctness check only) -----------
def _convt2d_ref(x, w, b, stride=1, padding=0, output_padding=0):
    k = w.shape[2]
    wf = jnp.transpose(w[:, :, ::-1, ::-1], (1, 0, 2, 3))   # (Cout, Cin, kH, kW)
    lo = k - 1 - padding
    hi = k - 1 - padding + output_padding
    y = jax.lax.conv_general_dilated(
        x, wf, window_strides=(1, 1), padding=((lo, hi), (lo, hi)),
        lhs_dilation=(stride, stride),
        dimension_numbers=("NCHW", "OIHW", "NCHW"))
    return y + b[None, :, None, None]


def upsample_ref(x, params):
    (w1, b1), (w2, b2), (w3, b3), (w4, b4) = params
    x0 = jax.nn.relu(_convt2d_ref(x, w1, b1, 1, 0, 0))
    x0 = jax.nn.relu(_convt2d_ref(x0, w2, b2, 1, 0, 1))
    x0 = _convt2d_ref(x0, w3, b3, 1, 0, 2)
    x1 = _convt2d_ref(x, w4, b4, 2, 0, 0)
    return jax.nn.relu(x0 + x1)


if __name__ == "__main__":
    N, C, B, O = 2, 4, 8, 4      # batch, channels, bottleneck_channels, output_channels
    H = W = 6                    # module's branch shapes only agree for 6x6 inputs
    key = jax.random.PRNGKey(0)
    ks = jax.random.split(key, 9)

    def u(k, shape, fan_in):
        bound = 1.0 / math.sqrt(fan_in)
        return jax.random.uniform(k, shape, jnp.float32, -bound, bound)

    # ConvTranspose2d weight shape is (in_channels, out_channels, kH, kW)
    params = (
        (u(ks[0], (C, B, 1, 1), C), u(ks[1], (B,), C)),
        (u(ks[2], (B, B, 3, 3), B * 9), u(ks[3], (B,), B * 9)),
        (u(ks[4], (B, O, 1, 1), B), u(ks[5], (O,), B)),
        (u(ks[6], (C, O, 1, 1), C), u(ks[7], (O,), C)),
    )
    x = jax.random.normal(ks[8], (N, C, H, W), jnp.float32)

    fwd = jax.jit(upsample_forward)
    out = jax.block_until_ready(fwd(x, params))
    ref = jax.block_until_ready(upsample_ref(x, params))
    assert out.shape == (N, O, 2 * H - 1, 2 * W - 1)
    np.testing.assert_allclose(np.asarray(out), np.asarray(ref), rtol=1e-4, atol=1e-4)
    print("KERNEL_OK")
</pallas_src>

<mosaic_0001>
module attributes {stable_mosaic.version = 11 : i64} {
  func.func @upsample_kernel(%arg0: i32, %arg1: memref<2x144xf32, #tpu.memory_space<vmem>>, %arg2: memref<144x288xf32, #tpu.memory_space<vmem>>, %arg3: memref<1x288xf32, #tpu.memory_space<vmem>>, %arg4: memref<288x648xf32, #tpu.memory_space<vmem>>, %arg5: memref<1x648xf32, #tpu.memory_space<vmem>>, %arg6: memref<648x512xf32, #tpu.memory_space<vmem>>, %arg7: memref<144x512xf32, #tpu.memory_space<vmem>>, %arg8: memref<1x512xf32, #tpu.memory_space<vmem>>, %arg9: memref<2x512xf32, #tpu.memory_space<vmem>>) attributes {dimension_semantics = [#tpu.dimension_semantics<parallel>], iteration_bounds = array<i64: 1>, scalar_prefetch = 0 : i64, scratch_operands = 0 : i64, tpu.core_type = #tpu.core_type<tc>, window_params = [{transform_indices = @transform_0, window_bounds = array<i64: 2, 144>}, {pipeline_mode = #tpu.pipeline_mode<synchronous>, transform_indices = @transform_1, window_bounds = array<i64: 144, 288>}, {pipeline_mode = #tpu.pipeline_mode<synchronous>, transform_indices = @transform_2, window_bounds = array<i64: 1, 288>}, {pipeline_mode = #tpu.pipeline_mode<synchronous>, transform_indices = @transform_3, window_bounds = array<i64: 288, 648>}, {pipeline_mode = #tpu.pipeline_mode<synchronous>, transform_indices = @transform_4, window_bounds = array<i64: 1, 648>}, {pipeline_mode = #tpu.pipeline_mode<synchronous>, transform_indices = @transform_5, window_bounds = array<i64: 648, 512>}, {pipeline_mode = #tpu.pipeline_mode<synchronous>, transform_indices = @transform_6, window_bounds = array<i64: 144, 512>}, {pipeline_mode = #tpu.pipeline_mode<synchronous>, transform_indices = @transform_7, window_bounds = array<i64: 1, 512>}, {transform_indices = @transform_8, window_bounds = array<i64: 2, 512>}]} {
    %c0 = arith.constant 0 : index
    %c0_0 = arith.constant 0 : index
    %0 = vector.load %arg1[%c0, %c0_0] : memref<2x144xf32, #tpu.memory_space<vmem>>, vector<2x144xf32>
    %c0_1 = arith.constant 0 : index
    %c0_2 = arith.constant 0 : index
    %1 = vector.load %arg2[%c0_1, %c0_2] : memref<144x288xf32, #tpu.memory_space<vmem>>, vector<144x288xf32>
    %cst = arith.constant dense<0.000000e+00> : vector<2x288xf32>
    %2 = tpu.matmul %0, %1, %cst {dimension_numbers = #tpu.dot_dimension_numbers<[1], [0], [0], [1], [0, 0, 1, 1], [], []>} : vector<2x144xf32>, vector<144x288xf32>, vector<2x288xf32> -> vector<2x288xf32>
    %c0_3 = arith.constant 0 : index
    %c0_4 = arith.constant 0 : index
    %3 = vector.load %arg3[%c0_3, %c0_4] : memref<1x288xf32, #tpu.memory_space<vmem>>, vector<1x288xf32>
    %4 = vector.broadcast %3 : vector<1x288xf32> to vector<2x288xf32>
    %5 = arith.addf %2, %4 : vector<2x288xf32>
    %cst_5 = arith.constant 0.000000e+00 : f32
    %6 = vector.broadcast %cst_5 : f32 to vector<2x288xf32>
    %7 = arith.maximumf %5, %6 : vector<2x288xf32>
    %c0_6 = arith.constant 0 : index
    %c0_7 = arith.constant 0 : index
    %8 = vector.load %arg4[%c0_6, %c0_7] : memref<288x648xf32, #tpu.memory_space<vmem>>, vector<288x648xf32>
    %cst_8 = arith.constant dense<0.000000e+00> : vector<2x648xf32>
    %9 = tpu.matmul %7, %8, %cst_8 {dimension_numbers = #tpu.dot_dimension_numbers<[1], [0], [0], [1], [0, 0, 1, 1], [], []>} : vector<2x288xf32>, vector<288x648xf32>, vector<2x648xf32> -> vector<2x648xf32>
    %c0_9 = arith.constant 0 : index
    %c0_10 = arith.constant 0 : index
    %10 = vector.load %arg5[%c0_9, %c0_10] : memref<1x648xf32, #tpu.memory_space<vmem>>, vector<1x648xf32>
    %11 = vector.broadcast %10 : vector<1x648xf32> to vector<2x648xf32>
    %12 = arith.addf %9, %11 : vector<2x648xf32>
    %cst_11 = arith.constant 0.000000e+00 : f32
    %13 = vector.broadcast %cst_11 : f32 to vector<2x648xf32>
    %14 = arith.maximumf %12, %13 : vector<2x648xf32>
    %c0_12 = arith.constant 0 : index
    %c0_13 = arith.constant 0 : index
    %15 = vector.load %arg6[%c0_12, %c0_13] : memref<648x512xf32, #tpu.memory_space<vmem>>, vector<648x512xf32>
    %cst_14 = arith.constant dense<0.000000e+00> : vector<2x512xf32>
    %16 = tpu.matmul %14, %15, %cst_14 {dimension_numbers = #tpu.dot_dimension_numbers<[1], [0], [0], [1], [0, 0, 1, 1], [], []>} : vector<2x648xf32>, vector<648x512xf32>, vector<2x512xf32> -> vector<2x512xf32>
    %c0_15 = arith.constant 0 : index
    %c0_16 = arith.constant 0 : index
    %17 = vector.load %arg7[%c0_15, %c0_16] : memref<144x512xf32, #tpu.memory_space<vmem>>, vector<144x512xf32>
    %cst_17 = arith.constant dense<0.000000e+00> : vector<2x512xf32>
    %18 = tpu.matmul %0, %17, %cst_17 {dimension_numbers = #tpu.dot_dimension_numbers<[1], [0], [0], [1], [0, 0, 1, 1], [], []>} : vector<2x144xf32>, vector<144x512xf32>, vector<2x512xf32> -> vector<2x512xf32>
    %19 = arith.addf %16, %18 : vector<2x512xf32>
    %c0_18 = arith.constant 0 : index
    %c0_19 = arith.constant 0 : index
    %20 = vector.load %arg8[%c0_18, %c0_19] : memref<1x512xf32, #tpu.memory_space<vmem>>, vector<1x512xf32>
    %21 = vector.broadcast %20 : vector<1x512xf32> to vector<2x512xf32>
    %22 = arith.addf %19, %21 : vector<2x512xf32>
    %cst_20 = arith.constant 0.000000e+00 : f32
    %23 = vector.broadcast %cst_20 : f32 to vector<2x512xf32>
    %24 = arith.maximumf %22, %23 : vector<2x512xf32>
    %c0_21 = arith.constant 0 : index
    %c0_22 = arith.constant 0 : index
    %25 = vector.load %arg9[%c0_21, %c0_22] : memref<2x512xf32, #tpu.memory_space<vmem>>, vector<2x512xf32>
    tpu.vector_store %arg9[%c0_21, %c0_22], %24 {strides = array<i32>} : memref<2x512xf32, #tpu.memory_space<vmem>>, vector<2x512xf32>,
    return
  }
  func.func @transform_0(%arg0: i32) -> (i32, i32) {
    %c0_i32 = arith.constant 0 : i32
    %c0_i32_0 = arith.constant 0 : i32
    return %arg0, %c0_i32 : i32, i32
  }
  func.func @transform_1(%arg0: i32) -> (i32, i32) {
    %c0_i32 = arith.constant 0 : i32
    %c0_i32_0 = arith.constant 0 : i32
    %c0_i32_1 = arith.constant 0 : i32
    return %c0_i32, %c0_i32_0 : i32, i32
  }
  func.func @transform_2(%arg0: i32) -> (i32, i32) {
    %c0_i32 = arith.constant 0 : i32
    %c0_i32_0 = arith.constant 0 : i32
    %c0_i32_1 = arith.constant 0 : i32
    return %c0_i32, %c0_i32_0 : i32, i32
  }
  func.func @transform_3(%arg0: i32) -> (i32, i32) {
    %c0_i32 = arith.constant 0 : i32
    %c0_i32_0 = arith.constant 0 : i32
    %c0_i32_1 = arith.constant 0 : i32
    return %c0_i32, %c0_i32_0 : i32, i32
  }
  func.func @transform_4(%arg0: i32) -> (i32, i32) {
    %c0_i32 = arith.constant 0 : i32
    %c0_i32_0 = arith.constant 0 : i32
    %c0_i32_1 = arith.constant 0 : i32
    return %c0_i32, %c0_i32_0 : i32, i32
  }
  func.func @transform_5(%arg0: i32) -> (i32, i32) {
    %c0_i32 = arith.constant 0 : i32
    %c0_i32_0 = arith.constant 0 : i32
    %c0_i32_1 = arith.constant 0 : i32
    return %c0_i32, %c0_i32_0 : i32, i32
  }
  func.func @transform_6(%arg0: i32) -> (i32, i32) {
    %c0_i32 = arith.constant 0 : i32
    %c0_i32_0 = arith.constant 0 : i32
    %c0_i32_1 = arith.constant 0 : i32
    return %c0_i32, %c0_i32_0 : i32, i32
  }
  func.func @transform_7(%arg0: i32) -> (i32, i32) {
    %c0_i32 = arith.constant 0 : i32
    %c0_i32_0 = arith.constant 0 : i32
    %c0_i32_1 = arith.constant 0 : i32
    return %c0_i32, %c0_i32_0 : i32, i32
  }
  func.func @transform_8(%arg0: i32) -> (i32, i32) {
    %c0_i32 = arith.constant 0 : i32
    %c0_i32_0 = arith.constant 0 : i32
    return %arg0, %c0_i32 : i32, i32
  }
}

</mosaic_0001>

<bundles_post_ra>
// kernel: upsample_forward.1
= control target key start
LH: loop header
LB: loop body
LE: loop exit
PB: predicated region body
PF: predicated region fallthrough
CT: control target
= control target key end

     0   :  { %v2676_v3 = vmov 0.0|0.0   ;;  %vm111_vm0 = vcmask 130048   ;;  %vm506_vm1 = vcmask 261120   ;;  %vm1480_vm2 = vcmask 64512   ;;  %s4879_s1 = inlined_call_operand.vmem [shape: f32[144,288], index: 1, kind: input, shape index: {}]   ;;  %s4880_s0 = inlined_call_operand.vmem [shape: f32[2,144], index: 0, kind: input, shape index: {}]   ;;  %s4881_s3 = inlined_call_operand.vmem [shape: f32[288,648], index: 3, kind: input, shape index: {}]   ;;  %s4882_s2 = inlined_call_operand.vmem [shape: f32[1,288], index: 2, kind: input, shape index: {}]   ;;  %s4883_s6 = inlined_call_operand.vmem [shape: f32[144,512], index: 6, kind: input, shape index: {}]   ;;  %s4884_s5 = inlined_call_operand.vmem [shape: f32[648,512], index: 5, kind: input, shape index: {}]   ;;  %s4885_s4 = inlined_call_operand.vmem [shape: f32[1,648], index: 4, kind: input, shape index: {}]   ;;  %s4886_s7 = inlined_call_operand.vmem [shape: f32[1,512], index: 7, kind: input, shape index: {}]   ;;  %s4887_s8 = inlined_call_operand.vmem [shape: f32[2,512], index: 8, kind: output, shape index: {}]  }
   0x1   :  { %v31_v0 = vld [vmem:[%s4879_s1 + $0x8] sm:$0xff]  ;;  %v34_v1 = vld [vmem:[%s4879_s1 + $0x20] sm:$0xff]  ;;  %2013 = vmatprep.subr.bf16.mxu1 %v2676_v3  ;;  %v33_v5 = vld [vmem:[%s4879_s1 + $0x18] sm:$0xff] }
   0x2   :  { %v30_v2 = vld [vmem:[%s4879_s1] sm:$0xff]  ;;  %v1977_v4 = vpack.c.bf16 %v34_v1, %v31_v0  ;;  %v37_v6 = vld [vmem:[%s4879_s1 + $0x38] sm:$0xff]  ;;  %v40_v7 = vld [vmem:[%s4879_s1 + $0x50] sm:$0xff] }
   0x3   :  { %v1979_v8 = vpack.c.bf16 %v33_v5, %v30_v2  ;;  %v1981_v9 = vpack.c.bf16 %v40_v7, %v37_v6  ;;  %v36_v10 = vld [vmem:[%s4879_s1 + $0x30] sm:$0xff]  ;;  %v39_v11 = vld [vmem:[%s4879_s1 + $0x48] sm:$0xff]  ;;  %v46_v13 = vld [vmem:[%s4879_s1 + $0x80] sm:$0xff] }
   0x4   :  { %v43_v12 = vld [vmem:[%s4879_s1 + $0x68] sm:$0xff]  ;;  %1978 = vmatprep.subr.bf16.mxu0 %v1977_v4  ;;  %v1983_v14 = vpack.c.bf16 %v39_v11, %v36_v10  ;;  %v32_v15 = vld [vmem:[%s4879_s1 + $0x10] sm:$0xff]  ;;  %v42_v18 = vld [vmem:[%s4879_s1 + $0x60] sm:$0xff] }
   0x5   :  { %1980 = vmatpush1.bf16.msra.mxu0 %v1979_v8  ;;  %v35_v16 = vld [vmem:[%s4879_s1 + $0x28] sm:$0xff]  ;;  %v1985_v17 = vpack.c.bf16 %v46_v13, %v43_v12  ;;  %v45_v19 = vld [vmem:[%s4879_s1 + $0x78] sm:$0xff]  ;;  %v52_v22 = vld [vmem:[%s4879_s1 + $0xb0] sm:$0xff] }
   0x6   :  { %1982 = vmatprep.subr.bf16.mxu0 %v1981_v9  ;;  %v2014_v20 = vpack.c.bf16 %v35_v16, %v32_v15  ;;  %v49_v21 = vld [vmem:[%s4879_s1 + $0x98] sm:$0xff]  ;;  %v38_v23 = vld [vmem:[%s4879_s1 + $0x40] sm:$0xff]  ;;  %v1987_v26 = vpack.c.bf16 %v45_v19, %v42_v18  ;;  %v44_v27 = vld [vmem:[%s4879_s1 + $0x70] sm:$0xff] }
   0x7   :  { %v41_v24 = vld [vmem:[%s4879_s1 + $0x58] sm:$0xff]  ;;  %v47_v28 = vld [vmem:[%s4879_s1 + $0x88] sm:$0xff]  ;;  %v1989_v29 = vpack.c.bf16 %v52_v22, %v49_v21  ;;  %v48_v30 = vld [vmem:[%s4879_s1 + $0x90] sm:$0xff] }
   0x8   :  { %2015 = vmatpush1.bf16.msra.mxu1 %v2014_v20  ;;  %v2017_v25 = vpack.c.bf16 %v41_v24, %v38_v23  ;;  %v51_v31 = vld [vmem:[%s4879_s1 + $0xa8] sm:$0xff]  ;;  %v58_v33 = vld [vmem:[%s4879_s1 + $0xe0] sm:$0xff]  ;;  %v2020_v34 = vpack.c.bf16 %v47_v28, %v44_v27  ;;  %v53_v37 = vld [vmem:[%s4879_s1 + $0xb8] sm:$0xff] }
   0x9   :  { %1984 = vmatpush1.bf16.msra.mxu0 %v1983_v14  ;;  %2016 = vmatprep.subr.bf16.mxu1 %v2676_v3  ;;  %v55_v32 = vld [vmem:[%s4879_s1 + $0xc8] sm:$0xff]  ;;  %v1991_v35 = vpack.c.bf16 %v51_v31, %v48_v30  ;;  %v50_v36 = vld [vmem:[%s4879_s1 + $0xa0] sm:$0xff]  ;;  %v57_v40 = vld [vmem:[%s4879_s1 + $0xd8] sm:$0xff] }
   0xa   :  { %1986 = vmatprep.subr.bf16.mxu0 %v1985_v17  ;;  %v1993_v38 = vpack.c.bf16 %v58_v33, %v55_v32  ;;  %v54_v39 = vld [vmem:[%s4879_s1 + $0xc0] sm:$0xff]  ;;  %v61_v41 = vld [vmem:[%s4879_s1 + $0xf8] sm:$0xff]  ;;  %v64_v42 = vld [vmem:[%s4879_s1 + $0x110] sm:$0xff]  ;;  %v2023_v43 = vpack.c.bf16 %v53_v37, %v50_v36 }
   0xb   :  { %v1995_v44 = vpack.c.bf16 %v57_v40, %v54_v39  ;;  %v56_v45 = vld [vmem:[%s4879_s1 + $0xd0] sm:$0xff]  ;;  %v59_v46 = vld [vmem:[%s4879_s1 + $0xe8] sm:$0xff]  ;;  %v2827_v47 = vld.sshfl [vmem:[%s4880_s0] sm:$0x33 pattern:$0x76325410]  ;;  %v1997_v48 = vpack.c.bf16 %v64_v42, %v61_v41 }
   0xc   :  { %2018 = vmatpush1.bf16.msra.mxu1 %v2017_v25  ;;  %v60_v49 = vld [vmem:[%s4879_s1 + $0xf0] sm:$0xff]  ;;  %v63_v50 = vld [vmem:[%s4879_s1 + $0x108] sm:$0xff]  ;;  %v2837_v51 = vcombine.high %v2827_v47, %v2827_v47  ;;  %v70_v53 = vld [vmem:[%s4879_s1 + $0x140] sm:$0xff]  ;;  %v2026_v54 = vpack.c.bf16 %v59_v46, %v56_v45 }
   0xd   :  { %1988 = vmatpush1.bf16.msra.mxu0 %v1987_v26  ;;  %2019 = vmatprep.subr.bf16.mxu1 %v2676_v3  ;;  %v67_v52 = vld [vmem:[%s4879_s1 + $0x128] sm:$0xff]  ;;  %v1999_v55 = vpack.c.bf16 %v63_v50, %v60_v49  ;;  %v62_v56 = vld [vmem:[%s4879_s1 + $0x100] sm:$0xff]  ;;  %v65_v57 = vld [vmem:[%s4879_s1 + $0x118] sm:$0xff] }
   0xe   :  { %1990 = vmatprep.subr.bf16.mxu0 %v1989_v29  ;;  %1968 = vmatprep.mubr.msk.f32.mxu0 %vm111_vm0, %v2837_v51  ;;  %v2001_v58 = vpack.c.bf16 %v70_v53, %v67_v52  ;;  %v66_v59 = vld [vmem:[%s4879_s1 + $0x120] sm:$0xff]  ;;  %v69_v60 = vld [vmem:[%s4879_s1 + $0x138] sm:$0xff]  ;;  %v76_v62 = vld [vmem:[%s4879_s1 + $0x170] sm:$0xff]  ;;  %v2029_v63 = vpack.c.bf16 %v65_v57, %v62_v56 }
   0xf   :  { %1969 = vmatprep.mubr.msk.f32.mxu1 %vm111_vm0, %v2837_v51  ;;  %v73_v61 = vld [vmem:[%s4879_s1 + $0x158] sm:$0xff]  ;;  %v2003_v0 = vpack.c.bf16 %v69_v60, %v66_v59  ;;  %v68_v1 = vld [vmem:[%s4879_s1 + $0x130] sm:$0xff]  ;;  %v71_v2 = vld [vmem:[%s4879_s1 + $0x148] sm:$0xff] }
  0x10   :  { %2021 = vmatpush1.bf16.msra.mxu1 %v2020_v34  ;;  %v2005_v4 = vpack.c.bf16 %v76_v62, %v73_v61  ;;  %v72_v5 = vld [vmem:[%s4879_s1 + $0x150] sm:$0xff]  ;;  %v75_v6 = vld [vmem:[%s4879_s1 + $0x168] sm:$0xff]  ;;  %v82_v8 = vld [vmem:[%s4879_s1 + $0x1a0] sm:$0xff]  ;;  %v2032_v9 = vpack.c.bf16 %v71_v2, %v68_v1 }
  0x11   :  { %1992 = vmatpush1.bf16.msra.mxu0 %v1991_v35  ;;  %2022 = vmatprep.subr.bf16.mxu1 %v2676_v3  ;;  %v79_v7 = vld [vmem:[%s4879_s1 + $0x188] sm:$0xff]  ;;  %v2007_v10 = vpack.c.bf16 %v75_v6, %v72_v5  ;;  %v74_v11 = vld [vmem:[%s4879_s1 + $0x160] sm:$0xff]  ;;  %v77_v12 = vld [vmem:[%s4879_s1 + $0x178] sm:$0xff] }
  0x12   :  { %1994 = vmatprep.subr.bf16.mxu0 %v1993_v38  ;;  %v2009_v13 = vpack.c.bf16 %v82_v8, %v79_v7  ;;  %v78_v14 = vld [vmem:[%s4879_s1 + $0x180] sm:$0xff]  ;;  %v81_v15 = vld [vmem:[%s4879_s1 + $0x198] sm:$0xff]  ;;  %v259_v16 = vld [vmem:[%s4881_s3 + $0x8] sm:$0xff]  ;;  %v2035_v18 = vpack.c.bf16 %v77_v12, %v74_v11 }
  0x13   :  { %v265_v17 = vld [vmem:[%s4881_s3 + $0x38] sm:$0xff]  ;;  %v2011_v19 = vpack.c.bf16 %v81_v15, %v78_v14  ;;  %v80_v20 = vld [vmem:[%s4879_s1 + $0x190] sm:$0xff]  ;;  %v83_v21 = vld [vmem:[%s4879_s1 + $0x1a8] sm:$0xff] }
  0x14   :  { %2024 = vmatpush1.bf16.msra.mxu1 %v2023_v43  ;;  %v2040_v22 = vpack.c.bf16 %v265_v17, %v259_v16  ;;  %v258_v23 = vld [vmem:[%s4881_s3] sm:$0xff]  ;;  %v264_v24 = vld [vmem:[%s4881_s3 + $0x30] sm:$0xff]  ;;  %v271_v25 = vld [vmem:[%s4881_s3 + $0x68] sm:$0xff]  ;;  %v2038_v27 = vpack.c.bf16 %v83_v21, %v80_v20 }
  0x15   :  { %1996 = vmatpush1.bf16.msra.mxu0 %v1995_v44  ;;  %2025 = vmatprep.subr.bf16.mxu1 %v2676_v3  ;;  %v277_v26 = vld [vmem:[%s4881_s3 + $0x98] sm:$0xff]  ;;  %v2042_v28 = vpack.c.bf16 %v264_v24, %v258_v23  ;;  %v270_v30 = vld [vmem:[%s4881_s3 + $0x60] sm:$0xff]  ;;  %v276_v31 = vld [vmem:[%s4881_s3 + $0x90] sm:$0xff] }
  0x16   :  { %1998 = vmatprep.subr.bf16.mxu0 %v1997_v48  ;;  %v2044_v29 = vpack.c.bf16 %v277_v26, %v271_v25  ;;  %v283_v32 = vld [vmem:[%s4881_s3 + $0xc8] sm:$0xff]  ;;  %v289_v33 = vld [vmem:[%s4881_s3 + $0xf8] sm:$0xff]  ;;  %v282_v35 = vld [vmem:[%s4881_s3 + $0xc0] sm:$0xff] }
  0x17   :  { %v2048_v34 = vpack.c.bf16 %v289_v33, %v283_v32  ;;  %v288_v36 = vld [vmem:[%s4881_s3 + $0xf0] sm:$0xff]  ;;  %v295_v37 = vld [vmem:[%s4881_s3 + $0x128] sm:$0xff]  ;;  %v301_v38 = vld [vmem:[%s4881_s3 + $0x158] sm:$0xff] }
  0x18   :  { %2027 = vmatpush1.bf16.msra.mxu1 %v2026_v54  ;;  %v2050_v39 = vpack.c.bf16 %v288_v36, %v282_v35  ;;  %v2052_v40 = vpack.c.bf16 %v301_v38, %v295_v37  ;;  %v294_v41 = vld [vmem:[%s4881_s3 + $0x120] sm:$0xff]  ;;  %v300_v42 = vld [vmem:[%s4881_s3 + $0x150] sm:$0xff]  ;;  %v307_v43 = vld [vmem:[%s4881_s3 + $0x188] sm:$0xff] }
  0x19   :  { %2000 = vmatpush1.bf16.msra.mxu0 %v1999_v55  ;;  %2028 = vmatprep.subr.bf16.mxu1 %v2676_v3  ;;  %v313_v44 = vld [vmem:[%s4881_s3 + $0x1b8] sm:$0xff]  ;;  %v2054_v45 = vpack.c.bf16 %v300_v42, %v294_v41  ;;  %v306_v48 = vld [vmem:[%s4881_s3 + $0x180] sm:$0xff]  ;;  %v312_v49 = vld [vmem:[%s4881_s3 + $0x1b0] sm:$0xff] }
  0x1a   :  { %2002 = vmatprep.subr.bf16.mxu0 %v2001_v58  ;;  %v2056_v46 = vpack.c.bf16 %v313_v44, %v307_v43  ;;  %v319_v50 = vld [vmem:[%s4881_s3 + $0x1e8] sm:$0xff]  ;;  %v325_v52 = vld [vmem:[%s4881_s3 + $0x218] sm:$0xff]  ;;  %v2058_v53 = vpack.c.bf16 %v312_v49, %v306_v48  ;;  %v318_v55 = vld [vmem:[%s4881_s3 + $0x1e0] sm:$0xff] }
  0x1b   :  { %v2060_v54 = vpack.c.bf16 %v325_v52, %v319_v50  ;;  %v324_v56 = vld [vmem:[%s4881_s3 + $0x210] sm:$0xff]  ;;  %v331_v57 = vld [vmem:[%s4881_s3 + $0x248] sm:$0xff]  ;;  %v337_v58 = vld [vmem:[%s4881_s3 + $0x278] sm:$0xff] }
  0x1c   :  { %2030 = vmatpush1.bf16.msra.mxu1 %v2029_v63  ;;  %v2062_v59 = vpack.c.bf16 %v324_v56, %v318_v55  ;;  %v2064_v60 = vpack.c.bf16 %v337_v58, %v331_v57  ;;  %v330_v61 = vld [vmem:[%s4881_s3 + $0x240] sm:$0xff]  ;;  %v336_v62 = vld [vmem:[%s4881_s3 + $0x270] sm:$0xff]  ;;  %v343_v63 = vld [vmem:[%s4881_s3 + $0x2a8] sm:$0xff] }
  0x1d   :  { %2004 = vmatpush1.bf16.msra.mxu0 %v2003_v0  ;;  %2031 = vmatprep.subr.bf16.mxu1 %v2676_v3  ;;  %v349_v0 = vld [vmem:[%s4881_s3 + $0x2d8] sm:$0xff]  ;;  %v2066_v1 = vpack.c.bf16 %v336_v62, %v330_v61  ;;  %v348_v5 = vld [vmem:[%s4881_s3 + $0x2d0] sm:$0xff]  ;;  %v355_v6 = vld [vmem:[%s4881_s3 + $0x308] sm:$0xff] }
  0x1e   :  { %2006 = vmatprep.subr.bf16.mxu0 %v2005_v4  ;;  %v2068_v2 = vpack.c.bf16 %v349_v0, %v343_v63  ;;  %v342_v4 = vld [vmem:[%s4881_s3 + $0x2a0] sm:$0xff]  ;;  %v361_v7 = vld [vmem:[%s4881_s3 + $0x338] sm:$0xff]  ;;  %v360_v11 = vld [vmem:[%s4881_s3 + $0x330] sm:$0xff] }
  0x1f   :  { %v2070_v8 = vpack.c.bf16 %v348_v5, %v342_v4  ;;  %v367_v12 = vld [vmem:[%s4881_s3 + $0x368] sm:$0xff]  ;;  %v366_v16 = vld [vmem:[%s4881_s3 + $0x360] sm:$0xff]  ;;  %v372_v17 = vld [vmem:[%s4881_s3 + $0x390] sm:$0xff] }
  0x20   :  { %2033 = vmatpush1.bf16.msra.mxu1 %v2032_v9  ;;  %v2072_v9 = vpack.c.bf16 %v361_v7, %v355_v6  ;;  %v2078_v20 = vpack.c.bf16 %v372_v17, %v366_v16  ;;  %v384_v23 = vld [vmem:[%s4881_s3 + $0x3f0] sm:$0xff]  ;;  %v391_v24 = vld [vmem:[%s4881_s3 + $0x428] sm:$0xff]  ;;  %v397_v25 = vld [vmem:[%s4881_s3 + $0x458] sm:$0xff] }
  0x21   :  { %2008 = vmatpush1.bf16.msra.mxu0 %v2007_v10  ;;  %2034 = vmatprep.subr.bf16.mxu1 %v2676_v3  ;;  %v354_v10 = vld [vmem:[%s4881_s3 + $0x300] sm:$0xff]  ;;  %v415_v35 = vld [vmem:[%s4881_s3 + $0x4e8] sm:$0xff]  ;;  %v421_v36 = vld [vmem:[%s4881_s3 + $0x518] sm:$0xff] }
  0x22   :  { %2010 = vmatprep.subr.bf16.mxu0 %v2009_v13  ;;  %v373_v13 = vld [vmem:[%s4881_s3 + $0x398] sm:$0xff]  ;;  %v2074_v14 = vpack.c.bf16 %v360_v11, %v354_v10  ;;  %v2092_v38 = vpack.c.bf16 %v421_v36, %v415_v35  ;;  %v427_v41 = vld [vmem:[%s4881_s3 + $0x548] sm:$0xff]  ;;  %v452_v62 = vld [vmem:[%s4881_s3 + $0x610] sm:$0xff] }
  0x23   :  { %v2076_v15 = vpack.c.bf16 %v373_v13, %v367_v12  ;;  %v433_v42 = vld [vmem:[%s4881_s3 + $0x578] sm:$0xff]  ;;  %v439_v49 = vld [vmem:[%s4881_s3 + $0x5a8] sm:$0xff]  ;;  %v458_v63 = vld [vmem:[%s4881_s3 + $0x640] sm:$0xff] }
  0x24   :  { %2036 = vmatpush1.bf16.msra.mxu1 %v2035_v18  ;;  %v379_v18 = vld [vmem:[%s4881_s3 + $0x3c8] sm:$0xff]  ;;  %v2096_v44 = vpack.c.bf16 %v433_v42, %v427_v41  ;;  %v445_v50 = vld [vmem:[%s4881_s3 + $0x5d8] sm:$0xff]  ;;  %v2178_v0 = vpack.c.bf16 %v458_v63, %v452_v62  ;;  %v464_v5 = vld [vmem:[%s4881_s3 + $0x670] sm:$0xff] }
  0x25   :  { %2012 = vmatpush1.bf16.msra.mxu0 %v2011_v19  ;;  %2037 = vmatprep.subr.bf16.mxu1 %v2676_v3  ;;  %v2046_v3 = vpack.c.bf16 %v276_v31, %v270_v30  ;;  %v385_v19 = vld [vmem:[%s4881_s3 + $0x3f8] sm:$0xff]  ;;  %v403_v30 = vld [vmem:[%s4881_s3 + $0x488] sm:$0xff]  ;;  %v2100_v52 = vpack.c.bf16 %v445_v50, %v439_v49  ;;  %v470_v6 = vld [vmem:[%s4881_s3 + $0x6a0] sm:$0xff] }
  0x26   :  { %2041 = vmatprep.subr.bf16.mxu0 %v2040_v22  ;;  %v2080_v21 = vpack.c.bf16 %v385_v19, %v379_v18  ;;  %v378_v22 = vld [vmem:[%s4881_s3 + $0x3c0] sm:$0xff]  ;;  %v409_v31 = vld [vmem:[%s4881_s3 + $0x4b8] sm:$0xff]  ;;  %v451_v56 = vld [vmem:[%s4881_s3 + $0x608] sm:$0xff]  ;;  %v2182_v7 = vpack.c.bf16 %v470_v6, %v464_v5 }
  0x27   :  { %v2082_v26 = vpack.c.bf16 %v384_v23, %v378_v22  ;;  %v2088_v33 = vpack.c.bf16 %v409_v31, %v403_v30  ;;  %v457_v57 = vld [vmem:[%s4881_s3 + $0x638] sm:$0xff]  ;;  %v84_v12 = vld [vmem:[%s4882_s2] sm:$0x7]  ;;  %v456_v22 = vld [vmem:[%s4881_s3 + $0x630] sm:$0xff] }
  0x28   :  { %179 = vmatmul.mubr.f32.vlgmr.msra.gmra.mrb[0].mxu0 %v2827_v47  ;;  %2039 = vmatpush1.bf16.msra.mxu1 %v2038_v27  ;;  %v2084_v27 = vpack.c.bf16 %v397_v25, %v391_v24  ;;  %v453_v58 = vld [vmem:[%s4881_s3 + $0x618] sm:$0xff]  ;;  %v463_v24 = vld [vmem:[%s4881_s3 + $0x668] sm:$0xff]  ;;  %v308_v63 = vld [vmem:[%s4881_s3 + $0x190] sm:$0xff] }
  0x29   :  { %2043 = vmatpush1.bf16.msra.mxu0 %v2042_v28  ;;  %v390_v28 = vld [vmem:[%s4881_s3 + $0x420] sm:$0xff]  ;;  %v469_v25 = vld [vmem:[%s4881_s3 + $0x698] sm:$0xff]  ;;  %v267_v36 = vld [vmem:[%s4881_s3 + $0x48] sm:$0xff] }
  0x2a   :  { %2045 = vmatprep.subr.bf16.mxu0 %v2044_v29  ;;  %v396_v29 = vld [vmem:[%s4881_s3 + $0x450] sm:$0xff]  ;;  %v261_v35 = vld [vmem:[%s4881_s3 + $0x18] sm:$0xff]  ;;  %v279_v42 = vld [vmem:[%s4881_s3 + $0xa8] sm:$0xff] }
  0x2b   :  { %250 = vmatmul.mubr.f32.vlgmr.msra.gmra.mrb[0].mxu1 %v2827_v47  ;;  %v2086_v32 = vpack.c.bf16 %v396_v29, %v390_v28  ;;  %v273_v41 = vld [vmem:[%s4881_s3 + $0x78] sm:$0xff]  ;;  %v291_v49 = vld [vmem:[%s4881_s3 + $0x108] sm:$0xff] }
  0x2c   :  { %v315_v62 = vld [vmem:[%s4881_s3 + $0x1c8] sm:$0xff] }
  0x2d   :  { %2047 = vmatpush1.bf16.msra.mxu0 %v2046_v3  ;;  %v402_v3 = vld [vmem:[%s4881_s3 + $0x480] sm:$0xff]  ;;  %v1267_v5 = vld [vmem:[%s4883_s6 + $0x8] sm:$0xff] }
  0x2e   :  { %2049 = vmatprep.subr.bf16.mxu0 %v2048_v34  ;;  %v408_v34 = vld [vmem:[%s4881_s3 + $0x4b0] sm:$0xff]  ;;  %v1271_v6 = vld [vmem:[%s4883_s6 + $0x28] sm:$0xff] }
  0x2f   :  { %v2090_v37 = vpack.c.bf16 %v408_v34, %v402_v3  ;;  %v468_v3 = vld [vmem:[%s4881_s3 + $0x690] sm:$0xff] }
  0x31   :  { %2051 = vmatpush1.bf16.msra.mxu0 %v2050_v39  ;;  %v414_v39 = vld [vmem:[%s4881_s3 + $0x4e0] sm:$0xff] }
  0x32   :  { %2053 = vmatprep.subr.bf16.mxu0 %v2052_v40  ;;  %v420_v40 = vld [vmem:[%s4881_s3 + $0x510] sm:$0xff] }
  0x33   :  { %v2094_v43 = vpack.c.bf16 %v420_v40, %v414_v39  ;;  %v260_v39 = vld [vmem:[%s4881_s3 + $0x10] sm:$0xff]  ;;  %v266_v40 = vld [vmem:[%s4881_s3 + $0x40] sm:$0xff] }
  0x35   :  { %2055 = vmatpush1.bf16.msra.mxu0 %v2054_v45  ;;  %v426_v45 = vld [vmem:[%s4881_s3 + $0x540] sm:$0xff] }
  0x36   :  { %2057 = vmatprep.subr.bf16.mxu0 %v2056_v46  ;;  %v432_v46 = vld [vmem:[%s4881_s3 + $0x570] sm:$0xff] }
  0x37   :  { %v2098_v48 = vpack.c.bf16 %v432_v46, %v426_v45  ;;  %v272_v45 = vld [vmem:[%s4881_s3 + $0x70] sm:$0xff]  ;;  %v278_v46 = vld [vmem:[%s4881_s3 + $0xa0] sm:$0xff] }
  0x38   :  { %v2118_v50 = vpack.c.bf16 %v278_v46, %v272_v45  ;;  %v1290_v45 = vld [vmem:[%s4883_s6 + $0xc0] sm:$0xff] }
  0x39   :  { %2059 = vmatpush1.bf16.msra.mxu0 %v2058_v53  ;;  %v438_v53 = vld [vmem:[%s4881_s3 + $0x5a0] sm:$0xff] }
  0x3a   :  { %2061 = vmatprep.subr.bf16.mxu0 %v2060_v54  ;;  %v444_v54 = vld [vmem:[%s4881_s3 + $0x5d0] sm:$0xff]  ;;  %v1294_v46 = vld [vmem:[%s4883_s6 + $0xe0] sm:$0xff] }
  0x3b   :  { %v2102_v55 = vpack.c.bf16 %v444_v54, %v438_v53  ;;  %v284_v53 = vld [vmem:[%s4881_s3 + $0xd0] sm:$0xff]  ;;  %v290_v54 = vld [vmem:[%s4881_s3 + $0x100] sm:$0xff] }
  0x3d   :  { %2063 = vmatpush1.bf16.msra.mxu0 %v2062_v59  ;;  %v2104_v59 = vpack.c.bf16 %v457_v57, %v451_v56  ;;  %v303_v56 = vld [vmem:[%s4881_s3 + $0x168] sm:$0xff]  ;;  %v2122_v57 = vpack.c.bf16 %v290_v54, %v284_v53  ;;  %v344_v53 = vld [vmem:[%s4881_s3 + $0x2b0] sm:$0xff]  ;;  %v350_v54 = vld [vmem:[%s4881_s3 + $0x2e0] sm:$0xff] }
  0x3e   :  { %2065 = vmatprep.subr.bf16.mxu0 %v2064_v60  ;;  %v459_v60 = vld [vmem:[%s4881_s3 + $0x648] sm:$0xff] }
  0x3f   :  { %v2176_v61 = vpack.c.bf16 %v459_v60, %v453_v58  ;;  %v302_v60 = vld [vmem:[%s4881_s3 + $0x160] sm:$0xff] }
  0x41   :  { %2067 = vmatpush1.bf16.msra.mxu0 %v2066_v1  ;;  %2177 = vmatprep.subr.bf16.mxu1 %v2176_v61  ;;  %v465_v1 = vld [vmem:[%s4881_s3 + $0x678] sm:$0xff] }
  0x42   :  { %2069 = vmatprep.subr.bf16.mxu0 %v2068_v2  ;;  %2179 = vmatpush1.bf16.msra.mxu1 %v2178_v0  ;;  %v471_v2 = vld [vmem:[%s4881_s3 + $0x6a8] sm:$0xff]  ;;  %v309_v61 = vld [vmem:[%s4881_s3 + $0x198] sm:$0xff]  ;;  %v314_v0 = vld [vmem:[%s4881_s3 + $0x1c0] sm:$0xff] }
  0x43   :  { %v2180_v4 = vpack.c.bf16 %v471_v2, %v465_v1  ;;  %v321_v2 = vld [vmem:[%s4881_s3 + $0x1f8] sm:$0xff] }
  0x45   :  { %2071 = vmatpush1.bf16.msra.mxu0 %v2070_v8  ;;  %2181 = vmatprep.subr.bf16.mxu1 %v2180_v4  ;;  %v2677_v8 = vmov 0.0   ;;  %v327_v4 = vld [vmem:[%s4881_s3 + $0x228] sm:$0xff] }
  0x46   :  { %2073 = vmatprep.subr.bf16.mxu0 %v2072_v9  ;;  %2183 = vmatpush1.bf16.msra.mxu1 %v2182_v7  ;;  %v86_v9 = vlaneseq  ;;  %v1266_v7 = vld [vmem:[%s4883_s6] sm:$0xff] }
  0x47   :  { %787 = vmatprep.mubr.f32.mxu1 %v2677_v8 }
  0x48   :  { %v3133_v10 = vshrl.u32 %v86_v9, 7  ;;  %v2128_v9 = vpack.c.bf16 %v315_v62, %v309_v61  ;;  %v363_v61 = vld [vmem:[%s4881_s3 + $0x348] sm:$0xff] }
  0x49   :  { %2075 = vmatpush1.bf16.msra.mxu0 %v2074_v14  ;;  %v1307_v62 = vld [vmem:[%s4883_s6 + $0x148] sm:$0xff] }
  0x4a   :  { %2077 = vmatprep.subr.bf16.mxu0 %v2076_v15  ;;  %v3136_v11 = vsub.s32 0, %v3133_v10  ;;  %v3142_v13 = vsub.s32 1, %v3133_v10  ;;  %v3145_v14 = vsub.s32 2, %v3133_v10 }
  0x4c   :  { %v89_v15 = vrot.slane %v84_v12, %v3136_v11  ;;  %v93_v16 = vrot.slane %v84_v12, %v3142_v13  ;;  %v97_v18 = vrot.slane %v84_v12, %v3145_v14  ;;  %v2256_v12 = vpack.c.bf16 %v1271_v6, %v1267_v5  ;;  %v369_v6 = vld [vmem:[%s4881_s3 + $0x378] sm:$0xff] }
  0x4d   :  { %2079 = vmatpush1.bf16.msra.mxu0 %v2078_v20 }
  0x4e   :  { %2081 = vmatprep.subr.bf16.mxu0 %v2080_v21  ;;  %v450_v21 = vld [vmem:[%s4881_s3 + $0x600] sm:$0xff]  ;;  %2257 = vmatprep.subr.bf16.mxu1 %v2256_v12 }
  0x4f   :  { %v2106_v28 = vpack.c.bf16 %v456_v22, %v450_v21  ;;  %v1278_v21 = vld [vmem:[%s4883_s6 + $0x60] sm:$0xff]  ;;  %v1283_v22 = vld [vmem:[%s4883_s6 + $0x88] sm:$0xff] }
  0x50   :  { %v1310_v12 = vld [vmem:[%s4883_s6 + $0x160] sm:$0xff] }
  0x51   :  { %2083 = vmatpush1.bf16.msra.mxu0 %v2082_v26 }
  0x52   :  { %2085 = vmatprep.subr.bf16.mxu0 %v2084_v27 }
  0x55   :  { %2087 = vmatpush1.bf16.msra.mxu0 %v2086_v32  ;;  %v2108_v32 = vpack.c.bf16 %v469_v25, %v463_v24  ;;  %v2130_v24 = vpack.c.bf16 %v314_v0, %v308_v63  ;;  %v320_v25 = vld [vmem:[%s4881_s3 + $0x1f0] sm:$0xff]  ;;  %v1311_v63 = vld [vmem:[%s4883_s6 + $0x168] sm:$0xff]  ;;  %v2142_v0 = vpack.c.bf16 %v350_v54, %v344_v53  ;;  %v1330_v53 = vld [vmem:[%s4883_s6 + $0x200] sm:$0xff] }
  0x56   :  { %2089 = vmatprep.subr.bf16.mxu0 %v2088_v33  ;;  %v462_v33 = vld [vmem:[%s4881_s3 + $0x660] sm:$0xff] }
  0x57   :  { %v1334_v54 = vld [vmem:[%s4883_s6 + $0x220] sm:$0xff] }
  0x59   :  { %2091 = vmatpush1.bf16.msra.mxu0 %v2090_v37  ;;  %v2110_v37 = vpack.c.bf16 %v468_v3, %v462_v33  ;;  %v1282_v33 = vld [vmem:[%s4883_s6 + $0x80] sm:$0xff] }
  0x5a   :  { %2093 = vmatprep.subr.bf16.mxu0 %v2092_v38  ;;  %v2112_v38 = vpack.c.bf16 %v267_v36, %v261_v35  ;;  %v1286_v3 = vld [vmem:[%s4883_s6 + $0xa0] sm:$0xff]  ;;  %v339_v35 = vld [vmem:[%s4881_s3 + $0x288] sm:$0xff] }
  0x5b   :  { %v1291_v36 = vld [vmem:[%s4883_s6 + $0xc8] sm:$0xff] }
  0x5d   :  { %2095 = vmatpush1.bf16.msra.mxu0 %v2094_v43  ;;  %v2114_v43 = vpack.c.bf16 %v266_v40, %v260_v39  ;;  %v332_v39 = vld [vmem:[%s4881_s3 + $0x250] sm:$0xff]  ;;  %v338_v40 = vld [vmem:[%s4881_s3 + $0x280] sm:$0xff] }
  0x5e   :  { %2097 = vmatprep.subr.bf16.mxu0 %v2096_v44  ;;  %v2116_v44 = vpack.c.bf16 %v279_v42, %v273_v41  ;;  %v2266_v41 = vpack.c.bf16 %v1286_v3, %v1282_v33  ;;  %v380_v33 = vld [vmem:[%s4881_s3 + $0x3d0] sm:$0xff]  ;;  %v386_v3 = vld [vmem:[%s4881_s3 + $0x400] sm:$0xff] }
  0x61   :  { %2099 = vmatpush1.bf16.msra.mxu0 %v2098_v48  ;;  %v285_v48 = vld [vmem:[%s4881_s3 + $0xd8] sm:$0xff] }
  0x62   :  { %2101 = vmatprep.subr.bf16.mxu0 %v2100_v52  ;;  %v2120_v52 = vpack.c.bf16 %v291_v49, %v285_v48  ;;  %v351_v48 = vld [vmem:[%s4881_s3 + $0x2e8] sm:$0xff] }
  0x63   :  { %v1299_v49 = vld [vmem:[%s4883_s6 + $0x108] sm:$0xff] }
  0x65   :  { %2103 = vmatpush1.bf16.msra.mxu0 %v2102_v55  ;;  %v297_v55 = vld [vmem:[%s4881_s3 + $0x138] sm:$0xff] }
  0x66   :  { %2105 = vmatprep.subr.bf16.mxu0 %v2104_v59  ;;  %v2124_v58 = vpack.c.bf16 %v303_v56, %v297_v55  ;;  %v296_v59 = vld [vmem:[%s4881_s3 + $0x130] sm:$0xff]  ;;  %v2270_v55 = vpack.c.bf16 %v1294_v46, %v1290_v45  ;;  %v398_v46 = vld [vmem:[%s4881_s3 + $0x460] sm:$0xff] }
  0x67   :  { %v2126_v1 = vpack.c.bf16 %v302_v60, %v296_v59  ;;  %v1298_v59 = vld [vmem:[%s4883_s6 + $0x100] sm:$0xff]  ;;  %v392_v45 = vld [vmem:[%s4881_s3 + $0x430] sm:$0xff] }
  0x68   :  { %v1302_v60 = vld [vmem:[%s4883_s6 + $0x120] sm:$0xff] }
  0xfb   :  { %v180_v17 = vpop.f32.mrb[0].mxu0 }
  0xfc   :  { %v181_v19 = vadd.f32 %v180_v17, %v89_v15  ;;  %v182_v20 = vpop.f32.mrb[1].mxu0  ;;  %v1270_v15 = vld [vmem:[%s4883_s6 + $0x20] sm:$0xff]  ;;  %v1279_v17 = vld [vmem:[%s4883_s6 + $0x68] sm:$0xff] }
  0xfd   :  { %v183_v23 = vadd.f32 %v182_v20, %v93_v16  ;;  %v1275_v16 = vld [vmem:[%s4883_s6 + $0x48] sm:$0xff]  ;;  %v1274_v20 = vld [vmem:[%s4883_s6 + $0x40] sm:$0xff] }
  0xfe   :  { %v251_v26 = vpop.f32.mrb[0].mxu1  ;;  %v3164_v31 = vmax.f32 %v181_v19, 0.0  ;;  %v2260_v19 = vpack.c.bf16 %v1279_v17, %v1275_v16  ;;  %v1315_v16 = vld [vmem:[%s4883_s6 + $0x188] sm:$0xff] }
  0xff   :  { %v3162_v27 = vmax.f32 %v183_v23, 0.0  ;;  %v252_v29 = vadd.f32 %v251_v26, %v97_v18  ;;  %v253_v30 = vpop.f32.mrb[1].mxu1  ;;  %v2258_v18 = vpack.c.bf16 %v1270_v15, %v1266_v7  ;;  %v1287_v23 = vld [vmem:[%s4883_s6 + $0xa8] sm:$0xff]  ;;  %v326_v26 = vld [vmem:[%s4881_s3 + $0x220] sm:$0xff]  ;;  %v2276_v7 = vpack.c.bf16 %v1311_v63, %v1307_v62  ;;  %v417_v63 = vld [vmem:[%s4881_s3 + $0x4f8] sm:$0xff] }
 0x100   :  { %v333_v30 = vld [vmem:[%s4881_s3 + $0x258] sm:$0xff]  ;;  %v375_v15 = vld [vmem:[%s4881_s3 + $0x3a8] sm:$0xff] }
 0x101   :  { %574 = vmatprep.mubr.f32.mxu0 %v3162_v27  ;;  %v3173_v34 = vmax.f32 %v252_v29, 0.0  ;;  %v2132_v29 = vpack.c.bf16 %v327_v4, %v321_v2  ;;  %v2136_v42 = vpack.c.bf16 %v339_v35, %v333_v30  ;;  %v362_v2 = vld [vmem:[%s4881_s3 + $0x340] sm:$0xff]  ;;  %v2274_v4 = vpack.c.bf16 %v1302_v60, %v1298_v59  ;;  %v1319_v17 = vld [vmem:[%s4883_s6 + $0x1a8] sm:$0xff]  ;;  %v404_v59 = vld [vmem:[%s4881_s3 + $0x490] sm:$0xff] }
 0x102   :  { %575 = vmatmul.mubr.f32.vlgmr.msra.gmra.mrb[2].mxu0 %v3164_v31  ;;  %v1327_v30 = vld [vmem:[%s4883_s6 + $0x1e8] sm:$0xff]  ;;  %v410_v60 = vld [vmem:[%s4881_s3 + $0x4c0] sm:$0xff] }
 0x103   :  { %2107 = vmatpush1.bf16.msra.mxu0 %v2106_v28  ;;  %645 = vmatprep.mubr.f32.mxu0 %v2677_v8  ;;  %v2262_v28 = vpack.c.bf16 %v1278_v21, %v1274_v20  ;;  %v374_v20 = vld [vmem:[%s4881_s3 + $0x3a0] sm:$0xff] }
 0x104   :  { %2109 = vmatprep.subr.bf16.mxu0 %v2108_v32  ;;  %1971 = vmatmul.mubr.msk.f32.vlgmr.msra.gmra.mrb[2].mxu1 %vm506_vm1, %v3173_v34  ;;  %v2264_v32 = vpack.c.bf16 %v1287_v23, %v1283_v22  ;;  %v2148_v22 = vpack.c.bf16 %v375_v15, %v369_v6  ;;  %v381_v23 = vld [vmem:[%s4881_s3 + $0x3d8] sm:$0xff] }
 0x105   :  { %1973 = vmatprep.mubr.msk.f32.mxu1 %vm111_vm0, %v2837_v51  ;;  %2259 = vmatpush1.bf16.msra.mxu1 %v2258_v18  ;;  %v1281_v6 = vld [vmem:[%s4883_s6 + $0x78] sm:$0xff] }
 0x106   :  { %2261 = vmatprep.subr.bf16.mxu1 %v2260_v19  ;;  %v368_v19 = vld [vmem:[%s4881_s3 + $0x370] sm:$0xff] }
 0x107   :  { %2111 = vmatpush1.bf16.msra.mxu0 %v2110_v37  ;;  %v1295_v37 = vld [vmem:[%s4883_s6 + $0xe8] sm:$0xff] }
 0x108   :  { %2113 = vmatprep.subr.bf16.mxu0 %v2112_v38  ;;  %v2134_v38 = vpack.c.bf16 %v326_v26, %v320_v25  ;;  %v1314_v25 = vld [vmem:[%s4883_s6 + $0x180] sm:$0xff] }
 0x109   :  { %2263 = vmatpush1.bf16.msra.mxu1 %v2262_v28  ;;  %v1318_v26 = vld [vmem:[%s4883_s6 + $0x1a0] sm:$0xff]  ;;  %v387_v28 = vld [vmem:[%s4881_s3 + $0x408] sm:$0xff] }
 0x10a   :  { %1970 = vmatmul.mubr.msk.f32.vlgmr.msra.gmra.mrb[2].mxu0 %vm506_vm1, %v3173_v34  ;;  %2265 = vmatprep.subr.bf16.mxu1 %v2264_v32  ;;  %v2150_v32 = vpack.c.bf16 %v374_v20, %v368_v19  ;;  %v2282_v35 = vpack.c.bf16 %v1318_v26, %v1314_v25  ;;  %v1276_v19 = vld [vmem:[%s4883_s6 + $0x50] sm:$0xff]  ;;  %v434_v26 = vld [vmem:[%s4881_s3 + $0x580] sm:$0xff] }
 0x10b   :  { %2115 = vmatpush1.bf16.msra.mxu0 %v2114_v43  ;;  %716 = vmatprep.mubr.f32.mxu0 %v3162_v27  ;;  %v345_v43 = vld [vmem:[%s4881_s3 + $0x2b8] sm:$0xff]  ;;  %v1280_v20 = vld [vmem:[%s4883_s6 + $0x70] sm:$0xff] }
 0x10c   :  { %2117 = vmatprep.subr.bf16.mxu0 %v2116_v44  ;;  %v2268_v44 = vpack.c.bf16 %v1295_v37, %v1291_v36  ;;  %v2140_v56 = vpack.c.bf16 %v351_v48, %v345_v43  ;;  %v2152_v36 = vpack.c.bf16 %v387_v28, %v381_v23  ;;  %v393_v37 = vld [vmem:[%s4881_s3 + $0x438] sm:$0xff]  ;;  %v1335_v43 = vld [vmem:[%s4883_s6 + $0x228] sm:$0xff]  ;;  %v428_v25 = vld [vmem:[%s4881_s3 + $0x550] sm:$0xff]  ;;  %v2298_v28 = vpack.c.bf16 %v1280_v20, %v1276_v19 }
 0x10d   :  { %2267 = vmatpush1.bf16.msra.mxu1 %v2266_v41  ;;  %v399_v41 = vld [vmem:[%s4881_s3 + $0x468] sm:$0xff]  ;;  %v1289_v23 = vld [vmem:[%s4883_s6 + $0xb8] sm:$0xff]  ;;  %v292_v19 = vld [vmem:[%s4881_s3 + $0x110] sm:$0xff] }
 0x10e   :  { %2269 = vmatprep.subr.bf16.mxu1 %v2268_v44  ;;  %v2154_v44 = vpack.c.bf16 %v386_v3, %v380_v33  ;;  %v1288_v33 = vld [vmem:[%s4883_s6 + $0xb0] sm:$0xff]  ;;  %v447_v3 = vld [vmem:[%s4881_s3 + $0x5e8] sm:$0xff] }
 0x10f   :  { %2119 = vmatpush1.bf16.msra.mxu0 %v2118_v50  ;;  %v1303_v50 = vld [vmem:[%s4883_s6 + $0x128] sm:$0xff] }
 0x110   :  { %2121 = vmatprep.subr.bf16.mxu0 %v2120_v52  ;;  %v2138_v52 = vpack.c.bf16 %v338_v40, %v332_v39  ;;  %v1322_v39 = vld [vmem:[%s4883_s6 + $0x1c0] sm:$0xff]  ;;  %v299_v20 = vld [vmem:[%s4881_s3 + $0x148] sm:$0xff] }
 0x111   :  { %2271 = vmatpush1.bf16.msra.mxu1 %v2270_v55  ;;  %v1326_v40 = vld [vmem:[%s4883_s6 + $0x1e0] sm:$0xff]  ;;  %v411_v55 = vld [vmem:[%s4881_s3 + $0x4c8] sm:$0xff] }
 0x112   :  { %v2286_v48 = vpack.c.bf16 %v1326_v40, %v1322_v39  ;;  %v446_v39 = vld [vmem:[%s4881_s3 + $0x5e0] sm:$0xff] }
 0x113   :  { %2123 = vmatpush1.bf16.msra.mxu0 %v2122_v57  ;;  %v357_v57 = vld [vmem:[%s4881_s3 + $0x318] sm:$0xff] }
 0x114   :  { %2125 = vmatprep.subr.bf16.mxu0 %v2124_v58  ;;  %v2272_v58 = vpack.c.bf16 %v1303_v50, %v1299_v49  ;;  %v2144_v5 = vpack.c.bf16 %v363_v61, %v357_v57  ;;  %v2156_v49 = vpack.c.bf16 %v399_v41, %v393_v37  ;;  %v405_v50 = vld [vmem:[%s4881_s3 + $0x498] sm:$0xff]  ;;  %v2290_v61 = vpack.c.bf16 %v1334_v54, %v1330_v53  ;;  %v262_v53 = vld [vmem:[%s4881_s3 + $0x20] sm:$0xff]  ;;  %v268_v54 = vld [vmem:[%s4881_s3 + $0x50] sm:$0xff] }
 0x115   :  { %v1273_v57 = vld [vmem:[%s4883_s6 + $0x38] sm:$0xff]  ;;  %v2160_v62 = vpack.c.bf16 %v411_v55, %v405_v50  ;;  %v2170_v37 = vpack.c.bf16 %v434_v26, %v428_v25  ;;  %v275_v55 = vld [vmem:[%s4881_s3 + $0x88] sm:$0xff] }
 0x116   :  { %2273 = vmatprep.subr.bf16.mxu1 %v2272_v58  ;;  %v2158_v58 = vpack.c.bf16 %v398_v46, %v392_v45  ;;  %v269_v45 = vld [vmem:[%s4881_s3 + $0x58] sm:$0xff] }
 0x117   :  { %2127 = vmatpush1.bf16.msra.mxu0 %v2126_v1  ;;  %v356_v1 = vld [vmem:[%s4881_s3 + $0x310] sm:$0xff]  ;;  %2275 = vmatpush1.bf16.msra.mxu1 %v2274_v4  ;;  %v423_v4 = vld [vmem:[%s4881_s3 + $0x528] sm:$0xff]  ;;  %v1301_v46 = vld [vmem:[%s4883_s6 + $0x118] sm:$0xff] }
 0x118   :  { %2129 = vmatprep.subr.bf16.mxu0 %v2128_v9  ;;  %v1306_v9 = vld [vmem:[%s4883_s6 + $0x140] sm:$0xff]  ;;  %v2146_v18 = vpack.c.bf16 %v362_v2, %v356_v1  ;;  %2277 = vmatprep.subr.bf16.mxu1 %v2276_v7  ;;  %v1268_v1 = vld [vmem:[%s4883_s6 + $0x10] sm:$0xff]  ;;  %v2162_v7 = vpack.c.bf16 %v410_v60, %v404_v59  ;;  %v1309_v60 = vld [vmem:[%s4883_s6 + $0x158] sm:$0xff] }
 0x119   :  { %v2278_v21 = vpack.c.bf16 %v1310_v12, %v1306_v9  ;;  %v1272_v2 = vld [vmem:[%s4883_s6 + $0x30] sm:$0xff]  ;;  %v422_v12 = vld [vmem:[%s4881_s3 + $0x520] sm:$0xff] }
 0x11a   :  { %v416_v9 = vld [vmem:[%s4881_s3 + $0x4f0] sm:$0xff]  ;;  %v2294_v15 = vpack.c.bf16 %v1272_v2, %v1268_v1  ;;  %v287_v2 = vld [vmem:[%s4881_s3 + $0xe8] sm:$0xff] }
 0x11b   :  { %2131 = vmatpush1.bf16.msra.mxu0 %v2130_v24  ;;  %v2280_v24 = vpack.c.bf16 %v1319_v17, %v1315_v16  ;;  %2279 = vmatpush1.bf16.msra.mxu1 %v2278_v21  ;;  %v2164_v16 = vpack.c.bf16 %v423_v4, %v417_v63  ;;  %v429_v17 = vld [vmem:[%s4881_s3 + $0x558] sm:$0xff]  ;;  %v435_v21 = vld [vmem:[%s4881_s3 + $0x588] sm:$0xff]  ;;  %v1304_v59 = vld [vmem:[%s4883_s6 + $0x130] sm:$0xff] }
 0x11c   :  { %2133 = vmatprep.subr.bf16.mxu0 %v2132_v29  ;;  %v1323_v29 = vld [vmem:[%s4883_s6 + $0x1c8] sm:$0xff]  ;;  %v280_v1 = vld [vmem:[%s4881_s3 + $0xb0] sm:$0xff] }
 0x11d   :  { %2281 = vmatprep.subr.bf16.mxu1 %v2280_v24  ;;  %v2166_v24 = vpack.c.bf16 %v422_v12, %v416_v9  ;;  %v1312_v9 = vld [vmem:[%s4883_s6 + $0x170] sm:$0xff]  ;;  %v1317_v12 = vld [vmem:[%s4883_s6 + $0x198] sm:$0xff] }
 0x11f   :  { %2135 = vmatpush1.bf16.msra.mxu0 %v2134_v38  ;;  %v2284_v38 = vpack.c.bf16 %v1327_v30, %v1323_v29  ;;  %2283 = vmatpush1.bf16.msra.mxu1 %v2282_v35  ;;  %v2168_v29 = vpack.c.bf16 %v435_v21, %v429_v17  ;;  %v441_v30 = vld [vmem:[%s4881_s3 + $0x5b8] sm:$0xff] }
 0x120   :  { %2137 = vmatprep.subr.bf16.mxu0 %v2136_v42  ;;  %v1331_v42 = vld [vmem:[%s4883_s6 + $0x208] sm:$0xff]  ;;  %v1293_v35 = vld [vmem:[%s4883_s6 + $0xd8] sm:$0xff]  ;;  %v2172_v41 = vpack.c.bf16 %v447_v3, %v441_v30 }
 0x121   :  { %2285 = vmatprep.subr.bf16.mxu1 %v2284_v38  ;;  %v440_v38 = vld [vmem:[%s4881_s3 + $0x5b0] sm:$0xff] }
 0x123   :  { %2139 = vmatpush1.bf16.msra.mxu0 %v2138_v52  ;;  %v2288_v52 = vpack.c.bf16 %v1335_v43, %v1331_v42  ;;  %2287 = vmatpush1.bf16.msra.mxu1 %v2286_v48  ;;  %v263_v42 = vld [vmem:[%s4881_s3 + $0x28] sm:$0xff]  ;;  %v1292_v43 = vld [vmem:[%s4883_s6 + $0xd0] sm:$0xff]  ;;  %v1305_v48 = vld [vmem:[%s4883_s6 + $0x138] sm:$0xff] }
 0x124   :  { %2141 = vmatprep.subr.bf16.mxu0 %v2140_v56  ;;  %v1269_v56 = vld [vmem:[%s4883_s6 + $0x18] sm:$0xff] }
 0x125   :  { %2289 = vmatprep.subr.bf16.mxu1 %v2288_v52  ;;  %v2184_v52 = vpack.c.bf16 %v269_v45, %v263_v42  ;;  %v335_v45 = vld [vmem:[%s4881_s3 + $0x268] sm:$0xff] }
 0x127   :  { %2143 = vmatpush1.bf16.msra.mxu0 %v2142_v0  ;;  %v2292_v0 = vpack.c.bf16 %v1273_v57, %v1269_v56  ;;  %2291 = vmatpush1.bf16.msra.mxu1 %v2290_v61  ;;  %v2308_v56 = vpack.c.bf16 %v1305_v48, %v1301_v46  ;;  %v281_v57 = vld [vmem:[%s4881_s3 + $0xb8] sm:$0xff] }
 0x128   :  { %2145 = vmatprep.subr.bf16.mxu0 %v2144_v5  ;;  %v1277_v5 = vld [vmem:[%s4883_s6 + $0x58] sm:$0xff]  ;;  %v2188_v63 = vpack.c.bf16 %v281_v57, %v275_v55 }
 0x129   :  { %2293 = vmatprep.subr.bf16.mxu1 %v2292_v0  ;;  %v1313_v61 = vld [vmem:[%s4883_s6 + $0x178] sm:$0xff]  ;;  %v274_v0 = vld [vmem:[%s4881_s3 + $0x80] sm:$0xff] }
 0x12a   :  { %1403 = vmatmul.mubr.f32.vlgmr.msra.gmra.mrb[4].mxu1 %v2827_v47  ;;  %v341_v46 = vld [vmem:[%s4881_s3 + $0x298] sm:$0xff] }
 0x12b   :  { %2147 = vmatpush1.bf16.msra.mxu0 %v2146_v18  ;;  %v2296_v18 = vpack.c.bf16 %v1281_v6, %v1277_v5  ;;  %2295 = vmatpush1.bf16.msra.mxu1 %v2294_v15  ;;  %v293_v5 = vld [vmem:[%s4881_s3 + $0x118] sm:$0xff]  ;;  %v2312_v6 = vpack.c.bf16 %v1313_v61, %v1309_v60 }
 0x12c   :  { %2149 = vmatprep.subr.bf16.mxu0 %v2148_v22  ;;  %v1285_v22 = vld [vmem:[%s4883_s6 + $0x98] sm:$0xff]  ;;  %1974 = vmatprep.mubr.msk.f32.mxu1 %vm111_vm0, %v2837_v51  ;;  %v2192_v17 = vpack.c.bf16 %v293_v5, %v287_v2  ;;  %v352_v2 = vld [vmem:[%s4881_s3 + $0x2f0] sm:$0xff]  ;;  %v359_v5 = vld [vmem:[%s4881_s3 + $0x328] sm:$0xff] }
 0x12d   :  { %2297 = vmatprep.subr.bf16.mxu1 %v2296_v18  ;;  %v2300_v47 = vpack.c.bf16 %v1289_v23, %v1285_v22  ;;  %v1321_v15 = vld [vmem:[%s4883_s6 + $0x1b8] sm:$0xff]  ;;  %v286_v18 = vld [vmem:[%s4881_s3 + $0xe0] sm:$0xff]  ;;  %v1316_v23 = vld [vmem:[%s4883_s6 + $0x190] sm:$0xff] }
 0x12e   :  { %v2316_v22 = vpack.c.bf16 %v1321_v15, %v1317_v12  ;;  %v2194_v25 = vpack.c.bf16 %v292_v19, %v286_v18  ;;  %v353_v57 = vld [vmem:[%s4881_s3 + $0x2f8] sm:$0xff]  ;;  %v1071_v12 = vld [vmem:[%s4884_s5 + $0x408] sm:$0xff] }
 0x12f   :  { %2151 = vmatpush1.bf16.msra.mxu0 %v2150_v32  ;;  %v1284_v32 = vld [vmem:[%s4883_s6 + $0x90] sm:$0xff]  ;;  %2299 = vmatpush1.bf16.msra.mxu1 %v2298_v28  ;;  %v298_v28 = vld [vmem:[%s4881_s3 + $0x140] sm:$0xff]  ;;  %v1075_v15 = vld [vmem:[%s4884_s5 + $0x428] sm:$0xff] }
 0x130   :  { %2153 = vmatprep.subr.bf16.mxu0 %v2152_v36  ;;  %v1297_v36 = vld [vmem:[%s4883_s6 + $0xf8] sm:$0xff]  ;;  %v2302_v40 = vpack.c.bf16 %v1288_v33, %v1284_v32  ;;  %2301 = vmatprep.subr.bf16.mxu1 %v2300_v47  ;;  %v311_v47 = vld [vmem:[%s4881_s3 + $0x1a8] sm:$0xff]  ;;  %v2392_v19 = vpack.c.bf16 %v1075_v15, %v1071_v12  ;;  %v1110_v15 = vld [vmem:[%s4884_s5 + $0x540] sm:$0xff] }
 0x131   :  { %v2304_v51 = vpack.c.bf16 %v1297_v36, %v1293_v35  ;;  %v317_v32 = vld [vmem:[%s4881_s3 + $0x1d8] sm:$0xff]  ;;  %v310_v35 = vld [vmem:[%s4881_s3 + $0x1a0] sm:$0xff]  ;;  %v316_v36 = vld [vmem:[%s4881_s3 + $0x1d0] sm:$0xff] }
 0x132   :  { %v2200_v3 = vpack.c.bf16 %v317_v32, %v311_v47  ;;  %v377_v18 = vld [vmem:[%s4881_s3 + $0x3b8] sm:$0xff]  ;;  %v1091_v47 = vld [vmem:[%s4884_s5 + $0x4a8] sm:$0xff] }
 0x133   :  { %2155 = vmatpush1.bf16.msra.mxu0 %v2154_v44  ;;  %v1296_v44 = vld [vmem:[%s4883_s6 + $0xf0] sm:$0xff]  ;;  %2303 = vmatpush1.bf16.msra.mxu1 %v2302_v40  ;;  %v1325_v40 = vld [vmem:[%s4883_s6 + $0x1d8] sm:$0xff] }
 0x134   :  { %2157 = vmatprep.subr.bf16.mxu0 %v2156_v49  ;;  %v2174_v49 = vpack.c.bf16 %v446_v39, %v440_v38  ;;  %v2306_v50 = vpack.c.bf16 %v1296_v44, %v1292_v43  ;;  %2305 = vmatprep.subr.bf16.mxu1 %v2304_v51  ;;  %v329_v38 = vld [vmem:[%s4881_s3 + $0x238] sm:$0xff]  ;;  %v2202_v39 = vpack.c.bf16 %v316_v36, %v310_v35  ;;  %v322_v51 = vld [vmem:[%s4881_s3 + $0x200] sm:$0xff]  ;;  %v328_v43 = vld [vmem:[%s4881_s3 + $0x230] sm:$0xff] }
 0x135   :  { %v2206_v48 = vpack.c.bf16 %v328_v43, %v322_v51  ;;  %v1086_v36 = vld [vmem:[%s4884_s5 + $0x480] sm:$0xff]  ;;  %v389_v51 = vld [vmem:[%s4881_s3 + $0x418] sm:$0xff] }
 0x137   :  { %2159 = vmatpush1.bf16.msra.mxu0 %v2158_v58  ;;  %v1300_v58 = vld [vmem:[%s4883_s6 + $0x110] sm:$0xff]  ;;  %2307 = vmatpush1.bf16.msra.mxu1 %v2306_v50 }
 0x138   :  { %2161 = vmatprep.subr.bf16.mxu0 %v2160_v62  ;;  %v2186_v62 = vpack.c.bf16 %v268_v54, %v262_v53  ;;  %2309 = vmatprep.subr.bf16.mxu1 %v2308_v56  ;;  %v2310_v4 = vpack.c.bf16 %v1304_v59, %v1300_v58  ;;  %v1328_v50 = vld [vmem:[%s4883_s6 + $0x1f0] sm:$0xff]  ;;  %v334_v53 = vld [vmem:[%s4881_s3 + $0x260] sm:$0xff]  ;;  %v347_v56 = vld [vmem:[%s4881_s3 + $0x2c8] sm:$0xff] }
 0x139   :  { %v340_v54 = vld [vmem:[%s4881_s3 + $0x290] sm:$0xff]  ;;  %v1333_v58 = vld [vmem:[%s4883_s6 + $0x218] sm:$0xff] }
 0x13a   :  { %v1337_v59 = vld [vmem:[%s4883_s6 + $0x238] sm:$0xff]  ;;  %v2210_v60 = vpack.c.bf16 %v340_v54, %v334_v53  ;;  %v1103_v53 = vld [vmem:[%s4884_s5 + $0x508] sm:$0xff] }
 0x13b   :  { %2163 = vmatpush1.bf16.msra.mxu0 %v2162_v7  ;;  %v1308_v7 = vld [vmem:[%s4883_s6 + $0x150] sm:$0xff]  ;;  %2311 = vmatpush1.bf16.msra.mxu1 %v2310_v4  ;;  %v2324_v61 = vpack.c.bf16 %v1337_v59, %v1333_v58  ;;  %v1107_v54 = vld [vmem:[%s4884_s5 + $0x528] sm:$0xff]  ;;  %v394_v59 = vld [vmem:[%s4881_s3 + $0x440] sm:$0xff] }
 0x13c   :  { %2165 = vmatprep.subr.bf16.mxu0 %v2164_v16  ;;  %v2190_v16 = vpack.c.bf16 %v280_v1, %v274_v0  ;;  %v2314_v21 = vpack.c.bf16 %v1312_v9, %v1308_v7  ;;  %2313 = vmatprep.subr.bf16.mxu1 %v2312_v6  ;;  %v2212_v0 = vpack.c.bf16 %v353_v57, %v347_v56  ;;  %v346_v1 = vld [vmem:[%s4881_s3 + $0x2c0] sm:$0xff]  ;;  %v365_v6 = vld [vmem:[%s4881_s3 + $0x358] sm:$0xff]  ;;  %v364_v9 = vld [vmem:[%s4881_s3 + $0x350] sm:$0xff] }
 0x13d   :  { %v358_v7 = vld [vmem:[%s4881_s3 + $0x320] sm:$0xff]  ;;  %v401_v56 = vld [vmem:[%s4881_s3 + $0x478] sm:$0xff] }
 0x13f   :  { %2167 = vmatpush1.bf16.msra.mxu0 %v2166_v24  ;;  %v1320_v24 = vld [vmem:[%s4883_s6 + $0x1b0] sm:$0xff]  ;;  %2315 = vmatpush1.bf16.msra.mxu1 %v2314_v21  ;;  %v1074_v21 = vld [vmem:[%s4884_s5 + $0x420] sm:$0xff] }
 0x140   :  { %2169 = vmatprep.subr.bf16.mxu0 %v2168_v29  ;;  %v304_v29 = vld [vmem:[%s4881_s3 + $0x170] sm:$0xff]  ;;  %v2318_v30 = vpack.c.bf16 %v1320_v24, %v1316_v23  ;;  %2317 = vmatprep.subr.bf16.mxu1 %v2316_v22  ;;  %v1079_v23 = vld [vmem:[%s4884_s5 + $0x448] sm:$0xff] }
 0x141   :  { %v2198_v33 = vpack.c.bf16 %v304_v29, %v298_v28  ;;  %v1083_v24 = vld [vmem:[%s4884_s5 + $0x468] sm:$0xff]  ;;  %v1082_v29 = vld [vmem:[%s4884_s5 + $0x460] sm:$0xff] }
 0x142   :  { %v2396_v28 = vpack.c.bf16 %v1083_v24, %v1079_v23  ;;  %v418_v24 = vld [vmem:[%s4881_s3 + $0x500] sm:$0xff] }
 0x143   :  { %2171 = vmatpush1.bf16.msra.mxu0 %v2170_v37  ;;  %2319 = vmatpush1.bf16.msra.mxu1 %v2318_v30  ;;  %v323_v37 = vld [vmem:[%s4881_s3 + $0x208] sm:$0xff] }
 0x144   :  { %2173 = vmatprep.subr.bf16.mxu0 %v2172_v41  ;;  %v1329_v41 = vld [vmem:[%s4883_s6 + $0x1f8] sm:$0xff]  ;;  %v2204_v42 = vpack.c.bf16 %v329_v38, %v323_v37  ;;  %v1087_v30 = vld [vmem:[%s4884_s5 + $0x488] sm:$0xff]  ;;  %v1090_v37 = vld [vmem:[%s4884_s5 + $0x4a0] sm:$0xff] }
 0x145   :  { %v2320_v44 = vpack.c.bf16 %v1329_v41, %v1325_v40  ;;  %v2400_v35 = vpack.c.bf16 %v1091_v47, %v1087_v30  ;;  %v1095_v40 = vld [vmem:[%s4884_s5 + $0x4c8] sm:$0xff]  ;;  %v2402_v43 = vpack.c.bf16 %v1090_v37, %v1086_v36  ;;  %v424_v30 = vld [vmem:[%s4881_s3 + $0x530] sm:$0xff]  ;;  %v430_v37 = vld [vmem:[%s4881_s3 + $0x560] sm:$0xff] }
 0x146   :  { %v1099_v41 = vld [vmem:[%s4884_s5 + $0x4e8] sm:$0xff]  ;;  %v2238_v36 = vpack.c.bf16 %v424_v30, %v418_v24  ;;  %v1158_v30 = vld [vmem:[%s4884_s5 + $0x6c0] sm:$0xff] }
 0x147   :  { %2175 = vmatpush1.bf16.msra.mxu0 %v2174_v49  ;;  %2321 = vmatprep.subr.bf16.mxu1 %v2320_v44  ;;  %v1324_v49 = vld [vmem:[%s4883_s6 + $0x1d0] sm:$0xff]  ;;  %v1127_v47 = vld [vmem:[%s4884_s5 + $0x5c8] sm:$0xff] }
 0x148   :  { %2185 = vmatprep.subr.bf16.mxu0 %v2184_v52  ;;  %v2208_v52 = vpack.c.bf16 %v341_v46, %v335_v45  ;;  %v2322_v55 = vpack.c.bf16 %v1328_v50, %v1324_v49  ;;  %v382_v45 = vld [vmem:[%s4881_s3 + $0x3e0] sm:$0xff]  ;;  %v2404_v46 = vpack.c.bf16 %v1099_v41, %v1095_v40  ;;  %v947_v24 = vld [vmem:[%s4884_s5 + $0x28] sm:$0xff] }
 0x149   :  { %v1098_v49 = vld [vmem:[%s4884_s5 + $0x4e0] sm:$0xff] }
 0x14a   :  { %717 = vmatmul.mubr.f32.vlgmr.msra.gmra.mrb[4].mxu0 %v3164_v31  ;;  %2323 = vmatpush1.bf16.msra.mxu1 %v2322_v55  ;;  %v395_v55 = vld [vmem:[%s4881_s3 + $0x448] sm:$0xff]  ;;  %v1130_v40 = vld [vmem:[%s4884_s5 + $0x5e0] sm:$0xff] }
 0x14b   :  { %2187 = vmatpush1.bf16.msra.mxu0 %v2186_v62  ;;  %858 = vmatprep.mubr.f32.mxu0 %v3162_v27  ;;  %v305_v27 = vld [vmem:[%s4881_s3 + $0x178] sm:$0xff]  ;;  %v1332_v62 = vld [vmem:[%s4883_s6 + $0x210] sm:$0xff] }
 0x14c   :  { %2189 = vmatprep.subr.bf16.mxu0 %v2188_v63  ;;  %v2196_v26 = vpack.c.bf16 %v305_v27, %v299_v20  ;;  %v1336_v63 = vld [vmem:[%s4883_s6 + $0x230] sm:$0xff]  ;;  %2325 = vmatprep.subr.bf16.mxu1 %v2324_v61  ;;  %v1070_v20 = vld [vmem:[%s4884_s5 + $0x400] sm:$0xff]  ;;  %v2216_v27 = vpack.c.bf16 %v365_v6, %v359_v5  ;;  %v413_v5 = vld [vmem:[%s4881_s3 + $0x4d8] sm:$0xff] }
 0x14d   :  { %v2326_v4 = vpack.c.bf16 %v1336_v63, %v1332_v62  ;;  %v2394_v22 = vpack.c.bf16 %v1074_v21, %v1070_v20  ;;  %v1102_v61 = vld [vmem:[%s4884_s5 + $0x500] sm:$0xff]  ;;  %v2228_v63 = vpack.c.bf16 %v401_v56, %v395_v55  ;;  %v1123_v20 = vld [vmem:[%s4884_s5 + $0x5a8] sm:$0xff]  ;;  %v448_v55 = vld [vmem:[%s4881_s3 + $0x5f0] sm:$0xff] }
 0x14e   :  { %v1106_v62 = vld [vmem:[%s4884_s5 + $0x520] sm:$0xff]  ;;  %v419_v21 = vld [vmem:[%s4881_s3 + $0x508] sm:$0xff] }
 0x14f   :  { %2191 = vmatpush1.bf16.msra.mxu0 %v2190_v16  ;;  %2327 = vmatpush1.bf16.msra.mxu1 %v2326_v4  ;;  %v2214_v16 = vpack.c.bf16 %v352_v2, %v346_v1  ;;  %v1111_v1 = vld [vmem:[%s4884_s5 + $0x548] sm:$0xff]  ;;  %v2410_v6 = vpack.c.bf16 %v1106_v62, %v1102_v61 }
 0x150   :  { %2193 = vmatprep.subr.bf16.mxu0 %v2192_v17  ;;  %v371_v17 = vld [vmem:[%s4881_s3 + $0x388] sm:$0xff]  ;;  %2393 = vmatprep.subr.bf16.mxu1 %v2392_v19 }
 0x151   :  { %v2220_v38 = vpack.c.bf16 %v377_v18, %v371_v17  ;;  %v1115_v2 = vld [vmem:[%s4884_s5 + $0x568] sm:$0xff]  ;;  %v412_v18 = vld [vmem:[%s4881_s3 + $0x4d0] sm:$0xff] }
 0x152   :  { %v407_v4 = vld [vmem:[%s4881_s3 + $0x4a8] sm:$0xff]  ;;  %v2412_v12 = vpack.c.bf16 %v1115_v2, %v1111_v1  ;;  %v454_v2 = vld [vmem:[%s4881_s3 + $0x620] sm:$0xff] }
 0x153   :  { %2195 = vmatpush1.bf16.msra.mxu0 %v2194_v25  ;;  %v1078_v25 = vld [vmem:[%s4884_s5 + $0x440] sm:$0xff]  ;;  %v2232_v17 = vpack.c.bf16 %v413_v5, %v407_v4  ;;  %v1119_v19 = vld [vmem:[%s4884_s5 + $0x588] sm:$0xff]  ;;  %v460_v4 = vld [vmem:[%s4881_s3 + $0x650] sm:$0xff] }
 0x154   :  { %2197 = vmatprep.subr.bf16.mxu0 %v2196_v26  ;;  %v2675_v26 = vld.sshfl [vmem:[%s4880_s0] sm:$0x33 pattern:$0x76325410]  ;;  %v2398_v32 = vpack.c.bf16 %v1082_v29, %v1078_v25  ;;  %v2416_v25 = vpack.c.bf16 %v1123_v20, %v1119_v19  ;;  %v1143_v56 = vld [vmem:[%s4884_s5 + $0x648] sm:$0xff]  ;;  %v472_v20 = vld [vmem:[%s4881_s3 + $0x6b0] sm:$0xff] }
 0x155   :  { %1474 = vmatmul.mubr.f32.vlgmr.msra.gmra.mrb[6].mxu1 %v2675_v26  ;;  %v1118_v26 = vld [vmem:[%s4884_s5 + $0x580] sm:$0xff]  ;;  %v467_v5 = vld [vmem:[%s4881_s3 + $0x688] sm:$0xff] }
 0x156   :  { %2395 = vmatpush1.bf16.msra.mxu1 %v2394_v22 }
 0x157   :  { %2199 = vmatpush1.bf16.msra.mxu0 %v2198_v33  ;;  %v2218_v33 = vpack.c.bf16 %v364_v9, %v358_v7  ;;  %2397 = vmatprep.subr.bf16.mxu1 %v2396_v28  ;;  %v406_v9 = vld [vmem:[%s4881_s3 + $0x4a0] sm:$0xff] }
 0x158   :  { %2201 = vmatprep.subr.bf16.mxu0 %v2200_v3  ;;  %v370_v3 = vld [vmem:[%s4881_s3 + $0x380] sm:$0xff]  ;;  %v2234_v23 = vpack.c.bf16 %v412_v18, %v406_v9  ;;  %v1155_v9 = vld [vmem:[%s4884_s5 + $0x6a8] sm:$0xff] }
 0x159   :  { %v1122_v28 = vld [vmem:[%s4884_s5 + $0x5a0] sm:$0xff] }
 0x15a   :  { %2399 = vmatpush1.bf16.msra.mxu1 %v2398_v32  ;;  %v1131_v32 = vld [vmem:[%s4884_s5 + $0x5e8] sm:$0xff]  ;;  %v1154_v18 = vld [vmem:[%s4884_s5 + $0x6a0] sm:$0xff] }
 0x15b   :  { %2203 = vmatpush1.bf16.msra.mxu0 %v2202_v39  ;;  %v376_v39 = vld [vmem:[%s4881_s3 + $0x3b0] sm:$0xff]  ;;  %2401 = vmatprep.subr.bf16.mxu1 %v2400_v35  ;;  %v2418_v35 = vpack.c.bf16 %v1122_v28, %v1118_v26  ;;  %v942_v28 = vld [vmem:[%s4884_s5] sm:$0xff] }
 0x15c   :  { %2205 = vmatprep.subr.bf16.mxu0 %v2204_v42  ;;  %v383_v42 = vld [vmem:[%s4881_s3 + $0x3e8] sm:$0xff]  ;;  %v2222_v44 = vpack.c.bf16 %v376_v39, %v370_v3  ;;  %v437_v3 = vld [vmem:[%s4881_s3 + $0x598] sm:$0xff]  ;;  %v1126_v39 = vld [vmem:[%s4884_s5 + $0x5c0] sm:$0xff] }
 0x15d   :  { %v2224_v50 = vpack.c.bf16 %v389_v51, %v383_v42  ;;  %v436_v42 = vld [vmem:[%s4881_s3 + $0x590] sm:$0xff]  ;;  %v1135_v51 = vld [vmem:[%s4884_s5 + $0x608] sm:$0xff] }
 0x15e   :  { %2403 = vmatpush1.bf16.msra.mxu1 %v2402_v43  ;;  %v1139_v43 = vld [vmem:[%s4884_s5 + $0x628] sm:$0xff] }
 0x15f   :  { %2207 = vmatpush1.bf16.msra.mxu0 %v2206_v48  ;;  %v1094_v48 = vld [vmem:[%s4884_s5 + $0x4c0] sm:$0xff]  ;;  %2405 = vmatprep.subr.bf16.mxu1 %v2404_v46  ;;  %v2422_v46 = vpack.c.bf16 %v1130_v40, %v1126_v39 }
 0x160   :  { %2209 = vmatprep.subr.bf16.mxu0 %v2208_v52  ;;  %v388_v52 = vld [vmem:[%s4881_s3 + $0x410] sm:$0xff]  ;;  %v2406_v57 = vpack.c.bf16 %v1098_v49, %v1094_v48  ;;  %v2242_v48 = vpack.c.bf16 %v436_v42, %v430_v37  ;;  %v442_v49 = vld [vmem:[%s4881_s3 + $0x5c0] sm:$0xff] }
 0x161   :  { %v2226_v58 = vpack.c.bf16 %v388_v52, %v382_v45  ;;  %v449_v45 = vld [vmem:[%s4881_s3 + $0x5f8] sm:$0xff]  ;;  %v1134_v52 = vld [vmem:[%s4884_s5 + $0x600] sm:$0xff]  ;;  %v2246_v61 = vpack.c.bf16 %v448_v55, %v442_v49 }
 0x162   :  { %2407 = vmatpush1.bf16.msra.mxu1 %v2406_v57  ;;  %v1147_v57 = vld [vmem:[%s4884_s5 + $0x668] sm:$0xff]  ;;  %v1166_v40 = vld [vmem:[%s4884_s5 + $0x700] sm:$0xff] }
 0x163   :  { %2211 = vmatpush1.bf16.msra.mxu0 %v2210_v60  ;;  %v2408_v60 = vpack.c.bf16 %v1107_v54, %v1103_v53  ;;  %v1138_v53 = vld [vmem:[%s4884_s5 + $0x620] sm:$0xff]  ;;  %v2428_v62 = vpack.c.bf16 %v1147_v57, %v1143_v56  ;;  %v967_v56 = vld [vmem:[%s4884_s5 + $0xc8] sm:$0xff] }
 0x164   :  { %2213 = vmatprep.subr.bf16.mxu0 %v2212_v0  ;;  %v400_v0 = vld [vmem:[%s4881_s3 + $0x470] sm:$0xff]  ;;  %v962_v55 = vld [vmem:[%s4884_s5 + $0xa0] sm:$0xff]  ;;  %v971_v57 = vld [vmem:[%s4884_s5 + $0xe8] sm:$0xff] }
 0x165   :  { %v2230_v7 = vpack.c.bf16 %v400_v0, %v394_v59  ;;  %2409 = vmatprep.subr.bf16.mxu1 %v2408_v60  ;;  %v461_v59 = vld [vmem:[%s4881_s3 + $0x658] sm:$0xff]  ;;  %v2426_v60 = vpack.c.bf16 %v1138_v53, %v1134_v52  ;;  %v1146_v0 = vld [vmem:[%s4884_s5 + $0x660] sm:$0xff] }
 0x166   :  { %2411 = vmatpush1.bf16.msra.mxu1 %v2410_v6  ;;  %v473_v6 = vld [vmem:[%s4881_s3 + $0x6b8] sm:$0xff]  ;;  %v1174_v52 = vld [vmem:[%s4884_s5 + $0x740] sm:$0xff] }
 0x167   :  { %2215 = vmatpush1.bf16.msra.mxu0 %v2214_v16  ;;  %v1114_v16 = vld [vmem:[%s4884_s5 + $0x560] sm:$0xff]  ;;  %2413 = vmatprep.subr.bf16.mxu1 %v2412_v12  ;;  %v2252_v19 = vpack.c.bf16 %v473_v6, %v467_v5 }
 0x168   :  { %2217 = vmatprep.subr.bf16.mxu0 %v2216_v27  ;;  %v425_v27 = vld [vmem:[%s4881_s3 + $0x538] sm:$0xff]  ;;  %v2414_v22 = vpack.c.bf16 %v1114_v16, %v1110_v15  ;;  %v2250_v15 = vpack.c.bf16 %v460_v4, %v454_v2  ;;  %v466_v16 = vld [vmem:[%s4881_s3 + $0x680] sm:$0xff]  ;;  %v1187_v2 = vld [vmem:[%s4884_s5 + $0x7a8] sm:$0xff] }
 0x169   :  { %v2236_v29 = vpack.c.bf16 %v425_v27, %v419_v21  ;;  %v1159_v27 = vld [vmem:[%s4884_s5 + $0x6c8] sm:$0xff]  ;;  %v2254_v26 = vpack.c.bf16 %v472_v20, %v466_v16  ;;  %v1178_v53 = vld [vmem:[%s4884_s5 + $0x760] sm:$0xff] }
 0x16a   :  { %2415 = vmatpush1.bf16.msra.mxu1 %v2414_v22  ;;  %v1163_v22 = vld [vmem:[%s4884_s5 + $0x6e8] sm:$0xff]  ;;  %v1182_v6 = vld [vmem:[%s4884_s5 + $0x780] sm:$0xff] }
 0x16b   :  { %2219 = vmatpush1.bf16.msra.mxu0 %v2218_v33  ;;  %v431_v33 = vld [vmem:[%s4881_s3 + $0x568] sm:$0xff]  ;;  %2417 = vmatprep.subr.bf16.mxu1 %v2416_v25 }
 0x16c   :  { %2221 = vmatprep.subr.bf16.mxu0 %v2220_v38  ;;  %v2420_v38 = vpack.c.bf16 %v1131_v32, %v1127_v47  ;;  %v2240_v41 = vpack.c.bf16 %v437_v3, %v431_v33  ;;  %v1162_v47 = vld [vmem:[%s4884_s5 + $0x6e0] sm:$0xff]  ;;  %v1171_v33 = vld [vmem:[%s4884_s5 + $0x728] sm:$0xff] }
 0x16d   :  { %v946_v32 = vld [vmem:[%s4884_s5 + $0x20] sm:$0xff]  ;;  %v951_v3 = vld [vmem:[%s4884_s5 + $0x48] sm:$0xff] }
 0x16e   :  { %2419 = vmatpush1.bf16.msra.mxu1 %v2418_v35  ;;  %v955_v35 = vld [vmem:[%s4884_s5 + $0x68] sm:$0xff]  ;;  %v2330_v37 = vpack.c.bf16 %v946_v32, %v942_v28 }
 0x16f   :  { %2223 = vmatpush1.bf16.msra.mxu0 %v2222_v44  ;;  %v443_v44 = vld [vmem:[%s4881_s3 + $0x5c8] sm:$0xff]  ;;  %2421 = vmatprep.subr.bf16.mxu1 %v2420_v38  ;;  %v950_v38 = vld [vmem:[%s4884_s5 + $0x40] sm:$0xff]  ;;  %v2332_v42 = vpack.c.bf16 %v955_v35, %v951_v3 }
 0x170   :  { %2225 = vmatprep.subr.bf16.mxu0 %v2224_v50  ;;  %v2424_v50 = vpack.c.bf16 %v1139_v43, %v1135_v51  ;;  %v2244_v54 = vpack.c.bf16 %v449_v45, %v443_v44  ;;  %v954_v51 = vld [vmem:[%s4884_s5 + $0x60] sm:$0xff]  ;;  %v1175_v43 = vld [vmem:[%s4884_s5 + $0x748] sm:$0xff] }
 0x171   :  { %v1179_v44 = vld [vmem:[%s4884_s5 + $0x768] sm:$0xff]  ;;  %v2334_v49 = vpack.c.bf16 %v954_v51, %v950_v38  ;;  %v990_v3 = vld [vmem:[%s4884_s5 + $0x180] sm:$0xff] }
 0x172   :  { %2423 = vmatpush1.bf16.msra.mxu1 %v2422_v46  ;;  %v959_v45 = vld [vmem:[%s4884_s5 + $0x88] sm:$0xff]  ;;  %v994_v35 = vld [vmem:[%s4884_s5 + $0x1a0] sm:$0xff] }
 0x173   :  { %2227 = vmatpush1.bf16.msra.mxu0 %v2226_v58  ;;  %v455_v58 = vld [vmem:[%s4881_s3 + $0x628] sm:$0xff]  ;;  %2425 = vmatprep.subr.bf16.mxu1 %v2424_v50  ;;  %v2444_v50 = vpack.c.bf16 %v1179_v44, %v1175_v43  ;;  %v2354_v38 = vpack.c.bf16 %v994_v35, %v990_v3  ;;  %v4221_v35 = vld [vmem:[%s4885_s4] sm:$0x3f] }
 0x174   :  { %2229 = vmatprep.subr.bf16.mxu0 %v2228_v63  ;;  %v1142_v63 = vld [vmem:[%s4884_s5 + $0x640] sm:$0xff]  ;;  %v2248_v1 = vpack.c.bf16 %v461_v59, %v455_v58  ;;  %v963_v46 = vld [vmem:[%s4884_s5 + $0xa8] sm:$0xff]  ;;  %v2446_v58 = vpack.c.bf16 %v1178_v53, %v1174_v52 }
 0x175   :  { %v2430_v12 = vpack.c.bf16 %v1146_v0, %v1142_v63  ;;  %v975_v63 = vld [vmem:[%s4884_s5 + $0x108] sm:$0xff]  ;;  %v1014_v53 = vld [vmem:[%s4884_s5 + $0x240] sm:$0xff] }
 0x176   :  { %2427 = vmatpush1.bf16.msra.mxu1 %v2426_v60  ;;  %v2340_v60 = vpack.c.bf16 %v971_v57, %v967_v56  ;;  %v979_v0 = vld [vmem:[%s4884_s5 + $0x128] sm:$0xff] }
 0x177   :  { %2231 = vmatpush1.bf16.msra.mxu0 %v2230_v7  ;;  %v1151_v7 = vld [vmem:[%s4884_s5 + $0x688] sm:$0xff]  ;;  %2429 = vmatprep.subr.bf16.mxu1 %v2428_v62  ;;  %v970_v62 = vld [vmem:[%s4884_s5 + $0xe0] sm:$0xff] }
 0x178   :  { %2233 = vmatprep.subr.bf16.mxu0 %v2232_v17  ;;  %v1150_v17 = vld [vmem:[%s4884_s5 + $0x680] sm:$0xff]  ;;  %v2432_v21 = vpack.c.bf16 %v1155_v9, %v1151_v7  ;;  %v2344_v9 = vpack.c.bf16 %v979_v0, %v975_v63  ;;  %v1195_v20 = vld [vmem:[%s4884_s5 + $0x7e8] sm:$0xff] }
 0x179   :  { %v2434_v25 = vpack.c.bf16 %v1154_v18, %v1150_v17  ;;  %v1186_v7 = vld [vmem:[%s4884_s5 + $0x7a0] sm:$0xff]  ;;  %v983_v17 = vld [vmem:[%s4884_s5 + $0x148] sm:$0xff] }
 0x17a   :  { %2431 = vmatpush1.bf16.msra.mxu1 %v2430_v12  ;;  %v974_v12 = vld [vmem:[%s4884_s5 + $0x100] sm:$0xff]  ;;  %v2450_v16 = vpack.c.bf16 %v1186_v7, %v1182_v6  ;;  %v987_v18 = vld [vmem:[%s4884_s5 + $0x168] sm:$0xff] }
 0x17b   :  { %2235 = vmatpush1.bf16.msra.mxu0 %v2234_v23  ;;  %v943_v23 = vld [vmem:[%s4884_s5 + $0x8] sm:$0xff]  ;;  %2433 = vmatprep.subr.bf16.mxu1 %v2432_v21  ;;  %v1030_v0 = vld [vmem:[%s4884_s5 + $0x2c0] sm:$0xff] }
 0x17c   :  { %2237 = vmatprep.subr.bf16.mxu0 %v2236_v29  ;;  %v2436_v29 = vpack.c.bf16 %v1163_v22, %v1159_v27  ;;  %v1190_v22 = vld [vmem:[%s4884_s5 + $0x7c0] sm:$0xff]  ;;  %v1011_v51 = vld [vmem:[%s4884_s5 + $0x228] sm:$0xff] }
 0x17d   :  { %v1038_v7 = vld [vmem:[%s4884_s5 + $0x300] sm:$0xff] }
 0x17e   :  { %2435 = vmatpush1.bf16.msra.mxu1 %v2434_v25  ;;  %v982_v25 = vld [vmem:[%s4884_s5 + $0x140] sm:$0xff] }
 0x17f   :  { %2239 = vmatpush1.bf16.msra.mxu0 %v2238_v36  ;;  %v2438_v36 = vpack.c.bf16 %v1162_v47, %v1158_v30  ;;  %2437 = vmatprep.subr.bf16.mxu1 %v2436_v29  ;;  %v991_v29 = vld [vmem:[%s4884_s5 + $0x188] sm:$0xff]  ;;  %v945_v47 = vld [vmem:[%s4884_s5 + $0x18] sm:$0xff] }
 0x180   :  { %2241 = vmatprep.subr.bf16.mxu0 %v2240_v41  ;;  %v1170_v41 = vld [vmem:[%s4884_s5 + $0x720] sm:$0xff]  ;;  %v995_v30 = vld [vmem:[%s4884_s5 + $0x1a8] sm:$0xff] }
 0x182   :  { %2439 = vmatpush1.bf16.msra.mxu1 %v2438_v36  ;;  %v999_v36 = vld [vmem:[%s4884_s5 + $0x1c8] sm:$0xff] }
 0x183   :  { %2243 = vmatpush1.bf16.msra.mxu0 %v2242_v48  ;;  %v2442_v48 = vpack.c.bf16 %v1170_v41, %v1166_v40  ;;  %v998_v40 = vld [vmem:[%s4884_s5 + $0x1c0] sm:$0xff] }
 0x184   :  { %2245 = vmatprep.subr.bf16.mxu0 %v2244_v54  ;;  %v2336_v54 = vpack.c.bf16 %v963_v46, %v959_v45  ;;  %v1002_v41 = vld [vmem:[%s4884_s5 + $0x1e0] sm:$0xff] }
 0x185   :  { %v2358_v43 = vpack.c.bf16 %v1002_v41, %v998_v40  ;;  %v1006_v45 = vld [vmem:[%s4884_s5 + $0x200] sm:$0xff] }
 0x186   :  { %v1010_v46 = vld [vmem:[%s4884_s5 + $0x220] sm:$0xff] }
 0x187   :  { %2247 = vmatpush1.bf16.msra.mxu0 %v2246_v61  ;;  %v966_v61 = vld [vmem:[%s4884_s5 + $0xc0] sm:$0xff] }
 0x188   :  { %2249 = vmatprep.subr.bf16.mxu0 %v2248_v1  ;;  %v1183_v1 = vld [vmem:[%s4884_s5 + $0x788] sm:$0xff]  ;;  %v2342_v4 = vpack.c.bf16 %v970_v62, %v966_v61 }
 0x189   :  { %v2448_v5 = vpack.c.bf16 %v1187_v2, %v1183_v1  ;;  %v1035_v61 = vld [vmem:[%s4884_s5 + $0x2e8] sm:$0xff]  ;;  %v1034_v1 = vld [vmem:[%s4884_s5 + $0x2e0] sm:$0xff] }
 0x18a   :  { %859 = vmatmul.mubr.f32.vlgmr.msra.gmra.mrb[6].mxu0 %v3164_v31  ;;  %v2328_v31 = vpack.c.bf16 %v947_v24, %v943_v23  ;;  %v1194_v23 = vld [vmem:[%s4884_s5 + $0x7e0] sm:$0xff]  ;;  %v2348_v24 = vpack.c.bf16 %v987_v18, %v983_v17  ;;  %v1039_v2 = vld [vmem:[%s4884_s5 + $0x308] sm:$0xff] }
 0x18b   :  { %2251 = vmatpush1.bf16.msra.mxu0 %v2250_v15  ;;  %929 = vmatprep.mubr.f32.mxu0 %v2677_v8  ;;  %v1167_v8 = vld [vmem:[%s4884_s5 + $0x708] sm:$0xff]  ;;  %v978_v15 = vld [vmem:[%s4884_s5 + $0x120] sm:$0xff]  ;;  %v2454_v28 = vpack.c.bf16 %v1194_v23, %v1190_v22 }
 0x18c   :  { %2253 = vmatprep.subr.bf16.mxu0 %v2252_v19  ;;  %v2440_v39 = vpack.c.bf16 %v1171_v33, %v1167_v8  ;;  %v1191_v19 = vld [vmem:[%s4884_s5 + $0x7c8] sm:$0xff]  ;;  %v2346_v21 = vpack.c.bf16 %v978_v15, %v974_v12  ;;  %v2352_v33 = vpack.c.bf16 %v995_v30, %v991_v29  ;;  %v1046_v18 = vld [vmem:[%s4884_s5 + $0x340] sm:$0xff] }
 0x18d   :  { %v2452_v27 = vpack.c.bf16 %v1195_v20, %v1191_v19  ;;  %v1047_v12 = vld [vmem:[%s4884_s5 + $0x348] sm:$0xff]  ;;  %v1050_v19 = vld [vmem:[%s4884_s5 + $0x360] sm:$0xff] }
 0x18e   :  { %2441 = vmatprep.subr.bf16.mxu1 %v2440_v39  ;;  %v1051_v15 = vld [vmem:[%s4884_s5 + $0x368] sm:$0xff]  ;;  %v1054_v23 = vld [vmem:[%s4884_s5 + $0x380] sm:$0xff] }
 0x18f   :  { %2255 = vmatpush1.bf16.msra.mxu0 %v2254_v26  ;;  %2443 = vmatpush1.bf16.msra.mxu1 %v2442_v48  ;;  %v986_v26 = vld [vmem:[%s4884_s5 + $0x160] sm:$0xff]  ;;  %v1015_v48 = vld [vmem:[%s4884_s5 + $0x248] sm:$0xff]  ;;  %v2380_v17 = vpack.c.bf16 %v1051_v15, %v1047_v12 }
 0x190   :  { %2329 = vmatprep.subr.bf16.mxu0 %v2328_v31  ;;  %2445 = vmatprep.subr.bf16.mxu1 %v2444_v50  ;;  %v949_v31 = vld [vmem:[%s4884_s5 + $0x38] sm:$0xff]  ;;  %v2350_v32 = vpack.c.bf16 %v986_v26, %v982_v25  ;;  %v2362_v50 = vpack.c.bf16 %v1010_v46, %v1006_v45  ;;  %v1055_v20 = vld [vmem:[%s4884_s5 + $0x388] sm:$0xff]  ;;  %v1062_v30 = vld [vmem:[%s4884_s5 + $0x3c0] sm:$0xff] }
 0x191   :  { %v2488_v8 = vpack.c.bf16 %v949_v31, %v945_v47  ;;  %v1063_v25 = vld [vmem:[%s4884_s5 + $0x3c8] sm:$0xff]  ;;  %v1066_v47 = vld [vmem:[%s4884_s5 + $0x3e0] sm:$0xff] }
 0x192   :  { %1972 = vmatmul.mubr.msk.f32.vlgmr.msra.gmra.mrb[6].mxu0 %vm506_vm1, %v3173_v34  ;;  %v958_v34 = vld [vmem:[%s4884_s5 + $0x80] sm:$0xff]  ;;  %v1067_v26 = vld [vmem:[%s4884_s5 + $0x3e8] sm:$0xff] }
 0x193   :  { %2331 = vmatpush1.bf16.msra.mxu0 %v2330_v37  ;;  %v2338_v59 = vpack.c.bf16 %v962_v55, %v958_v34  ;;  %2447 = vmatpush1.bf16.msra.mxu1 %v2446_v58  ;;  %v1003_v37 = vld [vmem:[%s4884_s5 + $0x1e8] sm:$0xff]  ;;  %v1022_v58 = vld [vmem:[%s4884_s5 + $0x280] sm:$0xff]  ;;  %v2388_v29 = vpack.c.bf16 %v1067_v26, %v1063_v25 }
 0x194   :  { %2333 = vmatprep.subr.bf16.mxu0 %v2332_v42  ;;  %2449 = vmatprep.subr.bf16.mxu1 %v2448_v5  ;;  %v2356_v39 = vpack.c.bf16 %v1003_v37, %v999_v36  ;;  %v1007_v42 = vld [vmem:[%s4884_s5 + $0x208] sm:$0xff]  ;;  %v2374_v5 = vpack.c.bf16 %v1034_v1, %v1030_v0  ;;  %v479_v37 = vrot.slane %v4221_v35, %v3136_v11  ;;  %v1226_v0 = vld [vmem:[%s4884_s5 + $0x8e0] sm:$0xff] }
 0x195   :  { %v2360_v44 = vpack.c.bf16 %v1011_v51, %v1007_v42  ;;  %v1023_v34 = vld [vmem:[%s4884_s5 + $0x288] sm:$0xff]  ;;  %v1198_v42 = vld [vmem:[%s4884_s5 + $0x800] sm:$0xff] }
 0x196   :  { %v1027_v55 = vld [vmem:[%s4884_s5 + $0x2a8] sm:$0xff]  ;;  %v1202_v51 = vld [vmem:[%s4884_s5 + $0x820] sm:$0xff] }
 0x197   :  { %2335 = vmatpush1.bf16.msra.mxu0 %v2334_v49  ;;  %2451 = vmatpush1.bf16.msra.mxu1 %v2450_v16  ;;  %v1019_v49 = vld [vmem:[%s4884_s5 + $0x268] sm:$0xff]  ;;  %v2368_v57 = vpack.c.bf16 %v1027_v55, %v1023_v34 }
 0x198   :  { %2337 = vmatprep.subr.bf16.mxu0 %v2336_v54  ;;  %2453 = vmatprep.subr.bf16.mxu1 %v2452_v27  ;;  %v2364_v52 = vpack.c.bf16 %v1019_v49, %v1015_v48  ;;  %v1018_v54 = vld [vmem:[%s4884_s5 + $0x260] sm:$0xff]  ;;  %v2382_v27 = vpack.c.bf16 %v1050_v19, %v1046_v18  ;;  %v1199_v31 = vld [vmem:[%s4884_s5 + $0x808] sm:$0xff]  ;;  %v2458_v48 = vpack.c.bf16 %v1202_v51, %v1198_v42 }
 0x199   :  { %v2366_v56 = vpack.c.bf16 %v1018_v54, %v1014_v53  ;;  %v1211_v45 = vld [vmem:[%s4884_s5 + $0x868] sm:$0xff]  ;;  %v1210_v53 = vld [vmem:[%s4884_s5 + $0x860] sm:$0xff] }
 0x19a   :  { %v1215_v54 = vld [vmem:[%s4884_s5 + $0x888] sm:$0xff]  ;;  %v1242_v18 = vld [vmem:[%s4884_s5 + $0x960] sm:$0xff] }
 0x19b   :  { %2339 = vmatpush1.bf16.msra.mxu0 %v2338_v59  ;;  %2455 = vmatpush1.bf16.msra.mxu1 %v2454_v28  ;;  %v1026_v59 = vld [vmem:[%s4884_s5 + $0x2a0] sm:$0xff]  ;;  %v1219_v34 = vld [vmem:[%s4884_s5 + $0x8a8] sm:$0xff] }
 0x19c   :  { %2341 = vmatprep.subr.bf16.mxu0 %v2340_v60  ;;  %2489 = vmatprep.subr.bf16.mxu1 %v2488_v8  ;;  %v1031_v60 = vld [vmem:[%s4884_s5 + $0x2c8] sm:$0xff]  ;;  %v2370_v62 = vpack.c.bf16 %v1026_v59, %v1022_v58  ;;  %v2390_v8 = vpack.c.bf16 %v1066_v47, %v1062_v30  ;;  %v1218_v58 = vld [vmem:[%s4884_s5 + $0x8a0] sm:$0xff] }
 0x19d   :  { %v2372_v63 = vpack.c.bf16 %v1035_v61, %v1031_v60  ;;  %v1223_v59 = vld [vmem:[%s4884_s5 + $0x8c8] sm:$0xff]  ;;  %v1258_v30 = vld [vmem:[%s4884_s5 + $0x9e0] sm:$0xff] }
 0x19e   :  { %v1227_v60 = vld [vmem:[%s4884_s5 + $0x8e8] sm:$0xff] }
 0x19f   :  { %2343 = vmatpush1.bf16.msra.mxu0 %v2342_v4  ;;  %v1043_v4 = vld [vmem:[%s4884_s5 + $0x328] sm:$0xff] }
 0x1a0   :  { %2345 = vmatprep.subr.bf16.mxu0 %v2344_v9  ;;  %v2376_v6 = vpack.c.bf16 %v1043_v4, %v1039_v2  ;;  %v1042_v9 = vld [vmem:[%s4884_s5 + $0x320] sm:$0xff]  ;;  %v1231_v1 = vld [vmem:[%s4884_s5 + $0x908] sm:$0xff] }
 0x1a1   :  { %v2378_v16 = vpack.c.bf16 %v1042_v9, %v1038_v7  ;;  %v1235_v2 = vld [vmem:[%s4884_s5 + $0x928] sm:$0xff]  ;;  %v1234_v7 = vld [vmem:[%s4884_s5 + $0x920] sm:$0xff] }
 0x1a2   :  { %v1239_v9 = vld [vmem:[%s4884_s5 + $0x948] sm:$0xff] }
 0x1a3   :  { %2347 = vmatpush1.bf16.msra.mxu0 %v2346_v21  ;;  %v1059_v21 = vld [vmem:[%s4884_s5 + $0x3a8] sm:$0xff] }
 0x1a4   :  { %2349 = vmatprep.subr.bf16.mxu0 %v2348_v24  ;;  %v2384_v22 = vpack.c.bf16 %v1059_v21, %v1055_v20  ;;  %v1058_v24 = vld [vmem:[%s4884_s5 + $0x3a0] sm:$0xff]  ;;  %v1243_v12 = vld [vmem:[%s4884_s5 + $0x968] sm:$0xff] }
 0x1a5   :  { %v2386_v28 = vpack.c.bf16 %v1058_v24, %v1054_v23  ;;  %v1247_v19 = vld [vmem:[%s4884_s5 + $0x988] sm:$0xff]  ;;  %v1250_v23 = vld [vmem:[%s4884_s5 + $0x9a0] sm:$0xff] }
 0x1a6   :  { %v1251_v20 = vld [vmem:[%s4884_s5 + $0x9a8] sm:$0xff] }
 0x1a7   :  { %2351 = vmatpush1.bf16.msra.mxu0 %v2350_v32  ;;  %v1203_v32 = vld [vmem:[%s4884_s5 + $0x828] sm:$0xff] }
 0x1a8   :  { %2353 = vmatprep.subr.bf16.mxu0 %v2352_v33  ;;  %v2456_v33 = vpack.c.bf16 %v1203_v32, %v1199_v31  ;;  %v1255_v24 = vld [vmem:[%s4884_s5 + $0x9c8] sm:$0xff]  ;;  %v1262_v32 = vld [vmem:[%s4884_s5 + $0xa00] sm:$0xff] }
 0x1a9   :  { %v1259_v25 = vld [vmem:[%s4884_s5 + $0x9e8] sm:$0xff] }
 0x1aa   :  { %v1263_v31 = vld [vmem:[%s4884_s5 + $0xa08] sm:$0xff] }
 0x1ab   :  { %2355 = vmatpush1.bf16.msra.mxu0 %v2354_v38  ;;  %v483_v38 = vrot.slane %v4221_v35, %v3142_v13 }
 0x1ac   :  { %2357 = vmatprep.subr.bf16.mxu0 %v2356_v39 }
 0x1af   :  { %2359 = vmatpush1.bf16.msra.mxu0 %v2358_v43 }
 0x1b0   :  { %2361 = vmatprep.subr.bf16.mxu0 %v2360_v44  ;;  %v1207_v44 = vld [vmem:[%s4884_s5 + $0x848] sm:$0xff] }
 0x1b3   :  { %2363 = vmatpush1.bf16.msra.mxu0 %v2362_v50  ;;  %v2460_v50 = vpack.c.bf16 %v1211_v45, %v1207_v44 }
 0x1b4   :  { %2365 = vmatprep.subr.bf16.mxu0 %v2364_v52  ;;  %v1206_v52 = vld [vmem:[%s4884_s5 + $0x840] sm:$0xff] }
 0x1b5   :  { %v2462_v55 = vpack.c.bf16 %v1210_v53, %v1206_v52  ;;  %v953_v53 = vld [vmem:[%s4884_s5 + $0x58] sm:$0xff] }
 0x1b7   :  { %2367 = vmatpush1.bf16.msra.mxu0 %v2366_v56  ;;  %v2464_v56 = vpack.c.bf16 %v1219_v34, %v1215_v54 }
 0x1b8   :  { %2369 = vmatprep.subr.bf16.mxu0 %v2368_v57  ;;  %v1214_v57 = vld [vmem:[%s4884_s5 + $0x880] sm:$0xff] }
 0x1b9   :  { %v2466_v61 = vpack.c.bf16 %v1218_v58, %v1214_v57  ;;  %v952_v57 = vld [vmem:[%s4884_s5 + $0x50] sm:$0xff]  ;;  %v961_v58 = vld [vmem:[%s4884_s5 + $0x98] sm:$0xff] }
 0x1bb   :  { %2371 = vmatpush1.bf16.msra.mxu0 %v2370_v62  ;;  %v2468_v62 = vpack.c.bf16 %v1227_v60, %v1223_v59  ;;  %v965_v59 = vld [vmem:[%s4884_s5 + $0xb8] sm:$0xff] }
 0x1bc   :  { %2373 = vmatprep.subr.bf16.mxu0 %v2372_v63  ;;  %v1222_v63 = vld [vmem:[%s4884_s5 + $0x8c0] sm:$0xff] }
 0x1bd   :  { %v2470_v4 = vpack.c.bf16 %v1226_v0, %v1222_v63  ;;  %v964_v63 = vld [vmem:[%s4884_s5 + $0xb0] sm:$0xff]  ;;  %v969_v0 = vld [vmem:[%s4884_s5 + $0xd8] sm:$0xff] }
 0x1bf   :  { %2375 = vmatpush1.bf16.msra.mxu0 %v2374_v5  ;;  %v2472_v5 = vpack.c.bf16 %v1235_v2, %v1231_v1  ;;  %v968_v2 = vld [vmem:[%s4884_s5 + $0xd0] sm:$0xff] }
 0x1c0   :  { %2377 = vmatprep.subr.bf16.mxu0 %v2376_v6  ;;  %v1230_v6 = vld [vmem:[%s4884_s5 + $0x900] sm:$0xff] }
 0x1c1   :  { %v2474_v15 = vpack.c.bf16 %v1234_v7, %v1230_v6  ;;  %v981_v6 = vld [vmem:[%s4884_s5 + $0x138] sm:$0xff] }
 0x1c3   :  { %2379 = vmatpush1.bf16.msra.mxu0 %v2378_v16  ;;  %v2476_v16 = vpack.c.bf16 %v1243_v12, %v1239_v9  ;;  %v976_v12 = vld [vmem:[%s4884_s5 + $0x110] sm:$0xff] }
 0x1c4   :  { %2381 = vmatprep.subr.bf16.mxu0 %v2380_v17  ;;  %v1238_v17 = vld [vmem:[%s4884_s5 + $0x940] sm:$0xff] }
 0x1c5   :  { %v2478_v21 = vpack.c.bf16 %v1242_v18, %v1238_v17  ;;  %v989_v17 = vld [vmem:[%s4884_s5 + $0x178] sm:$0xff] }
 0x1c7   :  { %2383 = vmatpush1.bf16.msra.mxu0 %v2382_v27  ;;  %v2480_v27 = vpack.c.bf16 %v1251_v20, %v1247_v19  ;;  %v984_v20 = vld [vmem:[%s4884_s5 + $0x150] sm:$0xff] }
 0x1c8   :  { %2385 = vmatprep.subr.bf16.mxu0 %v2384_v22  ;;  %v1246_v22 = vld [vmem:[%s4884_s5 + $0x980] sm:$0xff] }
 0x1c9   :  { %v2482_v26 = vpack.c.bf16 %v1250_v23, %v1246_v22  ;;  %v997_v22 = vld [vmem:[%s4884_s5 + $0x1b8] sm:$0xff] }
 0x1cb   :  { %2387 = vmatpush1.bf16.msra.mxu0 %v2386_v28  ;;  %v2484_v28 = vpack.c.bf16 %v1259_v25, %v1255_v24  ;;  %v992_v25 = vld [vmem:[%s4884_s5 + $0x190] sm:$0xff] }
 0x1cc   :  { %2389 = vmatprep.subr.bf16.mxu0 %v2388_v29  ;;  %v1254_v29 = vld [vmem:[%s4884_s5 + $0x9c0] sm:$0xff] }
 0x1cd   :  { %v2486_v47 = vpack.c.bf16 %v1258_v30, %v1254_v29  ;;  %v1005_v29 = vld [vmem:[%s4884_s5 + $0x1f8] sm:$0xff] }
 0x1cf   :  { %2391 = vmatpush1.bf16.msra.mxu0 %v2390_v8 }
 0x1d0   :  { %2457 = vmatprep.subr.bf16.mxu0 %v2456_v33 }
 0x1d7   :  { %v4216_v3 = vpop.f32.mrb[2].mxu1 }
 0x1d8   :  { %v4223_v36 = vpop.f32.mrb[3].mxu1 }
 0x1dd   :  { %v647_v39 = vpop.f32.mrb[2].mxu0 }
 0x1de   :  { %v4229_v40 = vadd.f32 %v647_v39, %v479_v37  ;;  %v649_v41 = vpop.f32.mrb[3].mxu0  ;;  %v490_v37 = vsub.s32 3, %v3133_v10 }
 0x1df   :  { %v4237_v43 = vadd.f32 %v649_v41, %v483_v38  ;;  %v487_v38 = vrot.slane %v4221_v35, %v3145_v14 }
 0x1e0   :  { %v936_v49 = vmax.f32 %v4229_v40, 0.0  ;;  %v491_v39 = vrot.slane %v4221_v35, %v490_v37  ;;  %v1092_v40 = vld [vmem:[%s4884_s5 + $0x4b0] sm:$0xff] }
 0x1e1   :  { %v937_v46 = vmax.f32 %v4237_v43, 0.0  ;;  %v973_v43 = vld [vmem:[%s4884_s5 + $0xf8] sm:$0xff] }
 0x1e2   :  { %v2500_v1 = vpack.c.bf16 %v973_v43, %v969_v0 }
 0x1e3   :  { %1548 = vmatprep.mubr.f32.mxu0 %v937_v46 }
 0x1e4   :  { %1549 = vmatmul.mubr.f32.vlgmr.msra.gmra.mrb[8].mxu0 %v936_v49 }
 0x1e5   :  { %2459 = vmatpush1.bf16.msra.mxu0 %v2458_v48  ;;  %v944_v48 = vld [vmem:[%s4884_s5 + $0x10] sm:$0xff] }
 0x1e6   :  { %2461 = vmatprep.subr.bf16.mxu0 %v2460_v50  ;;  %v948_v50 = vld [vmem:[%s4884_s5 + $0x30] sm:$0xff] }
 0x1e7   :  { %v2490_v34 = vpack.c.bf16 %v948_v50, %v944_v48  ;;  %v1017_v48 = vld [vmem:[%s4884_s5 + $0x258] sm:$0xff] }
 0x1e8   :  { %v1021_v50 = vld [vmem:[%s4884_s5 + $0x278] sm:$0xff] }
 0x1e9   :  { %2463 = vmatpush1.bf16.msra.mxu0 %v2462_v55 }
 0x1ea   :  { %2465 = vmatprep.subr.bf16.mxu0 %v2464_v56 }
 0x1ed   :  { %2467 = vmatpush1.bf16.msra.mxu0 %v2466_v61  ;;  %v2496_v61 = vpack.c.bf16 %v965_v59, %v961_v58 }
 0x1ee   :  { %2469 = vmatprep.subr.bf16.mxu0 %v2468_v62  ;;  %v960_v62 = vld [vmem:[%s4884_s5 + $0x90] sm:$0xff] }
 0x1f1   :  { %2471 = vmatpush1.bf16.msra.mxu0 %v2470_v4  ;;  %v972_v4 = vld [vmem:[%s4884_s5 + $0xf0] sm:$0xff] }
 0x1f2   :  { %2473 = vmatprep.subr.bf16.mxu0 %v2472_v5  ;;  %v977_v5 = vld [vmem:[%s4884_s5 + $0x118] sm:$0xff]  ;;  %v2502_v7 = vpack.c.bf16 %v972_v4, %v968_v2 }
 0x1f3   :  { %v2504_v9 = vpack.c.bf16 %v981_v6, %v977_v5  ;;  %v1041_v2 = vld [vmem:[%s4884_s5 + $0x318] sm:$0xff] }
 0x1f4   :  { %v1045_v4 = vld [vmem:[%s4884_s5 + $0x338] sm:$0xff] }
 0x1f5   :  { %2475 = vmatpush1.bf16.msra.mxu0 %v2474_v15  ;;  %v980_v15 = vld [vmem:[%s4884_s5 + $0x130] sm:$0xff]  ;;  %v2536_v6 = vpack.c.bf16 %v1045_v4, %v1041_v2 }
 0x1f6   :  { %2477 = vmatprep.subr.bf16.mxu0 %v2476_v16  ;;  %v985_v16 = vld [vmem:[%s4884_s5 + $0x158] sm:$0xff]  ;;  %v2506_v18 = vpack.c.bf16 %v980_v15, %v976_v12  ;;  %v1096_v4 = vld [vmem:[%s4884_s5 + $0x4d0] sm:$0xff] }
 0x1f7   :  { %v2508_v19 = vpack.c.bf16 %v989_v17, %v985_v16  ;;  %v1049_v12 = vld [vmem:[%s4884_s5 + $0x358] sm:$0xff] }
 0x1f8   :  { %v1053_v15 = vld [vmem:[%s4884_s5 + $0x378] sm:$0xff] }
 0x1f9   :  { %2479 = vmatpush1.bf16.msra.mxu0 %v2478_v21  ;;  %v988_v21 = vld [vmem:[%s4884_s5 + $0x170] sm:$0xff]  ;;  %v2540_v17 = vpack.c.bf16 %v1053_v15, %v1049_v12 }
 0x1fa   :  { %2481 = vmatprep.subr.bf16.mxu0 %v2480_v27  ;;  %v993_v27 = vld [vmem:[%s4884_s5 + $0x198] sm:$0xff]  ;;  %v2510_v23 = vpack.c.bf16 %v988_v21, %v984_v20  ;;  %v1104_v15 = vld [vmem:[%s4884_s5 + $0x510] sm:$0xff] }
 0x1fb   :  { %v2512_v24 = vpack.c.bf16 %v997_v22, %v993_v27  ;;  %v1057_v20 = vld [vmem:[%s4884_s5 + $0x398] sm:$0xff] }
 0x1fc   :  { %v1061_v21 = vld [vmem:[%s4884_s5 + $0x3b8] sm:$0xff] }
 0x1fd   :  { %2483 = vmatpush1.bf16.msra.mxu0 %v2482_v26  ;;  %v4335_v8 = vpop.f32.mrb[4].mxu1  ;;  %v996_v26 = vld [vmem:[%s4884_s5 + $0x1b0] sm:$0xff]  ;;  %v2544_v22 = vpack.c.bf16 %v1061_v21, %v1057_v20 }
 0x1fe   :  { %2485 = vmatprep.subr.bf16.mxu0 %v2484_v28  ;;  %v4337_v33 = vpop.f32.mrb[5].mxu1  ;;  %v1001_v28 = vld [vmem:[%s4884_s5 + $0x1d8] sm:$0xff]  ;;  %v2514_v30 = vpack.c.bf16 %v996_v26, %v992_v25  ;;  %v1112_v21 = vld [vmem:[%s4884_s5 + $0x550] sm:$0xff] }
 0x1ff   :  { %v1065_v25 = vld [vmem:[%s4884_s5 + $0x3d8] sm:$0xff] }
 0x200   :  { %v1069_v26 = vld [vmem:[%s4884_s5 + $0x3f8] sm:$0xff] }
 0x201   :  { %2487 = vmatpush1.bf16.msra.mxu0 %v2486_v47  ;;  %v2516_v47 = vpack.c.bf16 %v1005_v29, %v1001_v28  ;;  %v2548_v29 = vpack.c.bf16 %v1069_v26, %v1065_v25  ;;  %v1120_v26 = vld [vmem:[%s4884_s5 + $0x590] sm:$0xff] }
 0x202   :  { %1658 = vmatprep.subr.mxu0 %v1263_v31  ;;  %v1000_v31 = vld [vmem:[%s4884_s5 + $0x1d0] sm:$0xff] }
 0x205   :  { %1659 = vmatpush1.msra.mxu0 %v1262_v32  ;;  %v1004_v32 = vld [vmem:[%s4884_s5 + $0x1f0] sm:$0xff] }
 0x21d   :  { %v718_v41 = vpop.f32.mrb[4].mxu0 }
 0x21e   :  { %v719_v42 = vadd.f32 %v718_v41, %v487_v38  ;;  %v720_v51 = vpop.f32.mrb[5].mxu0  ;;  %v1009_v38 = vld [vmem:[%s4884_s5 + $0x218] sm:$0xff]  ;;  %v2518_v41 = vpack.c.bf16 %v1004_v32, %v1000_v31 }
 0x21f   :  { %v721_v44 = vadd.f32 %v720_v51, %v491_v39  ;;  %v1013_v39 = vld [vmem:[%s4884_s5 + $0x238] sm:$0xff]  ;;  %v1008_v51 = vld [vmem:[%s4884_s5 + $0x210] sm:$0xff] }
 0x220   :  { %v4346_v45 = vadd.f32 %v4216_v3, %v719_v42  ;;  %v957_v3 = vld [vmem:[%s4884_s5 + $0x78] sm:$0xff]  ;;  %v2520_v42 = vpack.c.bf16 %v1013_v39, %v1009_v38  ;;  %v494_v38 = vsub.s32 4, %v3133_v10 }
 0x221   :  { %v4355_v52 = vadd.f32 %v4223_v36, %v721_v44  ;;  %v2492_v56 = vpack.c.bf16 %v957_v3, %v953_v53  ;;  %v956_v36 = vld [vmem:[%s4884_s5 + $0x70] sm:$0xff]  ;;  %v2524_v3 = vpack.c.bf16 %v1021_v50, %v1017_v48  ;;  %v1073_v31 = vld [vmem:[%s4884_s5 + $0x418] sm:$0xff] }
 0x222   :  { %v938_v55 = vmax.f32 %v4346_v45, 0.0  ;;  %v2494_v60 = vpack.c.bf16 %v956_v36, %v952_v57  ;;  %v1012_v44 = vld [vmem:[%s4884_s5 + $0x230] sm:$0xff]  ;;  %v1025_v57 = vld [vmem:[%s4884_s5 + $0x298] sm:$0xff] }
 0x223   :  { %v939_v54 = vmax.f32 %v4355_v52, 0.0  ;;  %v2522_v53 = vpack.c.bf16 %v1012_v44, %v1008_v51  ;;  %v1029_v36 = vld [vmem:[%s4884_s5 + $0x2b8] sm:$0xff]  ;;  %v1072_v51 = vld [vmem:[%s4884_s5 + $0x410] sm:$0xff] }
 0x224   :  { %v2528_v59 = vpack.c.bf16 %v1029_v36, %v1025_v57  ;;  %v1077_v32 = vld [vmem:[%s4884_s5 + $0x438] sm:$0xff]  ;;  %v1076_v44 = vld [vmem:[%s4884_s5 + $0x430] sm:$0xff] }
 0x225   :  { %1619 = vmatprep.mubr.f32.mxu1 %v939_v54  ;;  %v1081_v48 = vld [vmem:[%s4884_s5 + $0x458] sm:$0xff]  ;;  %v1080_v57 = vld [vmem:[%s4884_s5 + $0x450] sm:$0xff] }
 0x226   :  { %1620 = vmatmul.mubr.f32.vlgmr.msra.gmra.mrb[8].mxu1 %v938_v55  ;;  %v1085_v50 = vld [vmem:[%s4884_s5 + $0x478] sm:$0xff]  ;;  %v1084_v36 = vld [vmem:[%s4884_s5 + $0x470] sm:$0xff] }
 0x227   :  { %2491 = vmatpush1.bf16.msra.mxu1 %v2490_v34  ;;  %1761 = vmatprep.mubr.f32.mxu1 %v937_v46  ;;  %v2498_v46 = vpack.c.bf16 %v964_v63, %v960_v62  ;;  %v1016_v34 = vld [vmem:[%s4884_s5 + $0x250] sm:$0xff]  ;;  %v1033_v62 = vld [vmem:[%s4884_s5 + $0x2d8] sm:$0xff] }
 0x228   :  { %2493 = vmatprep.subr.bf16.mxu1 %v2492_v56  ;;  %v1020_v56 = vld [vmem:[%s4884_s5 + $0x270] sm:$0xff]  ;;  %v1037_v63 = vld [vmem:[%s4884_s5 + $0x2f8] sm:$0xff] }
 0x229   :  { %v2526_v58 = vpack.c.bf16 %v1020_v56, %v1016_v34  ;;  %v2532_v43 = vpack.c.bf16 %v1037_v63, %v1033_v62  ;;  %v2554_v34 = vpack.c.bf16 %v1076_v44, %v1072_v51  ;;  %v2556_v56 = vpack.c.bf16 %v1085_v50, %v1081_v48  ;;  %v1101_v52 = vld [vmem:[%s4884_s5 + $0x4f8] sm:$0xff]  ;;  %v1136_v44 = vld [vmem:[%s4884_s5 + $0x610] sm:$0xff] }
 0x22a   :  { %v2558_v63 = vpack.c.bf16 %v1084_v36, %v1080_v57  ;;  %v1140_v48 = vld [vmem:[%s4884_s5 + $0x630] sm:$0xff]  ;;  %v1145_v50 = vld [vmem:[%s4884_s5 + $0x658] sm:$0xff] }
 0x22b   :  { %2495 = vmatpush1.bf16.msra.mxu1 %v2494_v60  ;;  %v1024_v60 = vld [vmem:[%s4884_s5 + $0x290] sm:$0xff]  ;;  %v1153_v36 = vld [vmem:[%s4884_s5 + $0x698] sm:$0xff] }
 0x22c   :  { %2497 = vmatprep.subr.bf16.mxu1 %v2496_v61  ;;  %v1028_v61 = vld [vmem:[%s4884_s5 + $0x2b0] sm:$0xff]  ;;  %v1225_v45 = vld [vmem:[%s4884_s5 + $0x8d8] sm:$0xff] }
 0x22d   :  { %v2530_v0 = vpack.c.bf16 %v1028_v61, %v1024_v60  ;;  %v1148_v57 = vld [vmem:[%s4884_s5 + $0x670] sm:$0xff] }
 0x22f   :  { %2499 = vmatpush1.bf16.msra.mxu1 %v2498_v46  ;;  %v1032_v46 = vld [vmem:[%s4884_s5 + $0x2d0] sm:$0xff] }
 0x230   :  { %2501 = vmatprep.subr.bf16.mxu1 %v2500_v1  ;;  %v1036_v1 = vld [vmem:[%s4884_s5 + $0x2f0] sm:$0xff] }
 0x231   :  { %v2534_v5 = vpack.c.bf16 %v1036_v1, %v1032_v46  ;;  %v1097_v46 = vld [vmem:[%s4884_s5 + $0x4d8] sm:$0xff] }
 0x232   :  { %v2564_v2 = vpack.c.bf16 %v1101_v52, %v1097_v46  ;;  %v1160_v52 = vld [vmem:[%s4884_s5 + $0x6d0] sm:$0xff] }
 0x233   :  { %2503 = vmatpush1.bf16.msra.mxu1 %v2502_v7  ;;  %v1040_v7 = vld [vmem:[%s4884_s5 + $0x310] sm:$0xff] }
 0x234   :  { %2505 = vmatprep.subr.bf16.mxu1 %v2504_v9  ;;  %v1044_v9 = vld [vmem:[%s4884_s5 + $0x330] sm:$0xff] }
 0x235   :  { %v2538_v16 = vpack.c.bf16 %v1044_v9, %v1040_v7  ;;  %v1109_v7 = vld [vmem:[%s4884_s5 + $0x538] sm:$0xff] }
 0x237   :  { %2507 = vmatpush1.bf16.msra.mxu1 %v2506_v18  ;;  %v1048_v18 = vld [vmem:[%s4884_s5 + $0x350] sm:$0xff] }
 0x238   :  { %2509 = vmatprep.subr.bf16.mxu1 %v2508_v19  ;;  %v1052_v19 = vld [vmem:[%s4884_s5 + $0x370] sm:$0xff] }
 0x239   :  { %v2542_v27 = vpack.c.bf16 %v1052_v19, %v1048_v18  ;;  %v1117_v18 = vld [vmem:[%s4884_s5 + $0x578] sm:$0xff] }
 0x23b   :  { %2511 = vmatpush1.bf16.msra.mxu1 %v2510_v23  ;;  %v1056_v23 = vld [vmem:[%s4884_s5 + $0x390] sm:$0xff] }
 0x23c   :  { %2513 = vmatprep.subr.bf16.mxu1 %v2512_v24  ;;  %v1060_v24 = vld [vmem:[%s4884_s5 + $0x3b0] sm:$0xff] }
 0x23d   :  { %v2546_v28 = vpack.c.bf16 %v1060_v24, %v1056_v23  ;;  %v1125_v23 = vld [vmem:[%s4884_s5 + $0x5b8] sm:$0xff] }
 0x23f   :  { %2515 = vmatpush1.bf16.msra.mxu1 %v2514_v30  ;;  %v1064_v30 = vld [vmem:[%s4884_s5 + $0x3d0] sm:$0xff] }
 0x240   :  { %2517 = vmatprep.subr.bf16.mxu1 %v2516_v47  ;;  %v1068_v47 = vld [vmem:[%s4884_s5 + $0x3f0] sm:$0xff] }
 0x241   :  { %v2550_v39 = vpack.c.bf16 %v1068_v47, %v1064_v30  ;;  %v1133_v30 = vld [vmem:[%s4884_s5 + $0x5f8] sm:$0xff] }
 0x243   :  { %2519 = vmatpush1.bf16.msra.mxu1 %v2518_v41  ;;  %v498_v41 = vsub.s32 5, %v3133_v10 }
 0x244   :  { %2521 = vmatprep.subr.bf16.mxu1 %v2520_v42  ;;  %v2552_v42 = vpack.c.bf16 %v1077_v32, %v1073_v31  ;;  %v1128_v32 = vld [vmem:[%s4884_s5 + $0x5d0] sm:$0xff] }
 0x247   :  { %2523 = vmatpush1.bf16.msra.mxu1 %v2522_v53  ;;  %v495_v53 = vrot.slane %v4221_v35, %v494_v38  ;;  %v1132_v38 = vld [vmem:[%s4884_s5 + $0x5f0] sm:$0xff] }
 0x248   :  { %2525 = vmatprep.subr.bf16.mxu1 %v2524_v3  ;;  %v499_v3 = vrot.slane %v4221_v35, %v498_v41  ;;  %v1093_v35 = vld [vmem:[%s4884_s5 + $0x4b8] sm:$0xff] }
 0x249   :  { %v1141_v41 = vld [vmem:[%s4884_s5 + $0x638] sm:$0xff] }
 0x24b   :  { %2527 = vmatpush1.bf16.msra.mxu1 %v2526_v58 }
 0x24c   :  { %2529 = vmatprep.subr.bf16.mxu1 %v2528_v59  ;;  %v1089_v59 = vld [vmem:[%s4884_s5 + $0x498] sm:$0xff] }
 0x24f   :  { %2531 = vmatpush1.bf16.msra.mxu1 %v2530_v0  ;;  %v2560_v0 = vpack.c.bf16 %v1093_v35, %v1089_v59 }
 0x250   :  { %2533 = vmatprep.subr.bf16.mxu1 %v2532_v43  ;;  %v1088_v43 = vld [vmem:[%s4884_s5 + $0x490] sm:$0xff] }
 0x251   :  { %v2562_v1 = vpack.c.bf16 %v1092_v40, %v1088_v43  ;;  %v1165_v43 = vld [vmem:[%s4884_s5 + $0x6f8] sm:$0xff] }
 0x253   :  { %2535 = vmatpush1.bf16.msra.mxu1 %v2534_v5  ;;  %v1100_v5 = vld [vmem:[%s4884_s5 + $0x4f0] sm:$0xff] }
 0x254   :  { %2537 = vmatprep.subr.bf16.mxu1 %v2536_v6  ;;  %v1105_v6 = vld [vmem:[%s4884_s5 + $0x518] sm:$0xff]  ;;  %v2566_v9 = vpack.c.bf16 %v1100_v5, %v1096_v4 }
 0x255   :  { %v2568_v12 = vpack.c.bf16 %v1109_v7, %v1105_v6  ;;  %v1173_v4 = vld [vmem:[%s4884_s5 + $0x738] sm:$0xff]  ;;  %v1168_v7 = vld [vmem:[%s4884_s5 + $0x710] sm:$0xff] }
 0x257   :  { %2539 = vmatpush1.bf16.msra.mxu1 %v2538_v16  ;;  %v1108_v16 = vld [vmem:[%s4884_s5 + $0x530] sm:$0xff] }
 0x258   :  { %2541 = vmatprep.subr.bf16.mxu1 %v2540_v17  ;;  %v1113_v17 = vld [vmem:[%s4884_s5 + $0x558] sm:$0xff]  ;;  %v2570_v19 = vpack.c.bf16 %v1108_v16, %v1104_v15 }
 0x259   :  { %v2572_v20 = vpack.c.bf16 %v1117_v18, %v1113_v17  ;;  %v1181_v15 = vld [vmem:[%s4884_s5 + $0x778] sm:$0xff]  ;;  %v1176_v18 = vld [vmem:[%s4884_s5 + $0x750] sm:$0xff] }
 0x25b   :  { %2543 = vmatpush1.bf16.msra.mxu1 %v2542_v27  ;;  %v1116_v27 = vld [vmem:[%s4884_s5 + $0x570] sm:$0xff] }
 0x25c   :  { %2545 = vmatprep.subr.bf16.mxu1 %v2544_v22  ;;  %v1121_v22 = vld [vmem:[%s4884_s5 + $0x598] sm:$0xff]  ;;  %v2574_v24 = vpack.c.bf16 %v1116_v27, %v1112_v21 }
 0x25d   :  { %v2576_v25 = vpack.c.bf16 %v1125_v23, %v1121_v22  ;;  %v1189_v21 = vld [vmem:[%s4884_s5 + $0x7b8] sm:$0xff]  ;;  %v1184_v23 = vld [vmem:[%s4884_s5 + $0x790] sm:$0xff] }
 0x25f   :  { %2547 = vmatpush1.bf16.msra.mxu1 %v2546_v28  ;;  %v1124_v28 = vld [vmem:[%s4884_s5 + $0x5b0] sm:$0xff] }
 0x260   :  { %2549 = vmatprep.subr.bf16.mxu1 %v2548_v29  ;;  %v1129_v29 = vld [vmem:[%s4884_s5 + $0x5d8] sm:$0xff]  ;;  %v2578_v47 = vpack.c.bf16 %v1124_v28, %v1120_v26 }
 0x261   :  { %v2580_v31 = vpack.c.bf16 %v1133_v30, %v1129_v29  ;;  %v1197_v26 = vld [vmem:[%s4884_s5 + $0x7f8] sm:$0xff]  ;;  %v1192_v30 = vld [vmem:[%s4884_s5 + $0x7d0] sm:$0xff] }
 0x263   :  { %2551 = vmatpush1.bf16.msra.mxu1 %v2550_v39  ;;  %v1137_v39 = vld [vmem:[%s4884_s5 + $0x618] sm:$0xff] }
 0x264   :  { %2553 = vmatprep.subr.bf16.mxu1 %v2552_v42  ;;  %v2582_v42 = vpack.c.bf16 %v1132_v38, %v1128_v32  ;;  %v2584_v51 = vpack.c.bf16 %v1141_v41, %v1137_v39  ;;  %v1205_v32 = vld [vmem:[%s4884_s5 + $0x838] sm:$0xff]  ;;  %v1200_v41 = vld [vmem:[%s4884_s5 + $0x810] sm:$0xff] }
 0x265   :  { %v931_v58 = vpop.f32.mrb[6].mxu0 }
 0x266   :  { %v4579_v60 = vadd.f32 %v931_v58, %v495_v53  ;;  %1762 = vmatmul.mubr.f32.vlgmr.msra.gmra.mrb[6].mxu1 %v936_v49  ;;  %v933_v61 = vpop.f32.mrb[7].mxu0  ;;  %v1149_v53 = vld [vmem:[%s4884_s5 + $0x678] sm:$0xff] }
 0x267   :  { %v4583_v62 = vadd.f32 %v933_v61, %v499_v3  ;;  %2555 = vmatpush1.bf16.msra.mxu1 %v2554_v34  ;;  %1832 = vmatprep.mubr.f32.mxu1 %v939_v54  ;;  %v2586_v3 = vpack.c.bf16 %v1140_v48, %v1136_v44  ;;  %v2588_v34 = vpack.c.bf16 %v1149_v53, %v1145_v50  ;;  %v1157_v58 = vld [vmem:[%s4884_s5 + $0x6b8] sm:$0xff]  ;;  %v1152_v61 = vld [vmem:[%s4884_s5 + $0x690] sm:$0xff] }
 0x268   :  { %2557 = vmatprep.subr.bf16.mxu1 %v2556_v56  ;;  %v940_v54 = vmax.f32 %v4579_v60, 0.0  ;;  %v1144_v56 = vld [vmem:[%s4884_s5 + $0x650] sm:$0xff]  ;;  %v2592_v35 = vpack.c.bf16 %v1157_v58, %v1153_v36  ;;  %v1213_v44 = vld [vmem:[%s4884_s5 + $0x878] sm:$0xff] }
 0x269   :  { %v941_v49 = vmax.f32 %v4583_v62, 0.0  ;;  %v2590_v59 = vpack.c.bf16 %v1148_v57, %v1144_v56  ;;  %v1208_v53 = vld [vmem:[%s4884_s5 + $0x850] sm:$0xff]  ;;  %v1221_v56 = vld [vmem:[%s4884_s5 + $0x8b8] sm:$0xff] }
 0x26a   :  { %v1216_v58 = vld [vmem:[%s4884_s5 + $0x890] sm:$0xff] }
 0x26b   :  { %2559 = vmatpush1.bf16.msra.mxu1 %v2558_v63  ;;  %1975 = vmatprep.mubr.msk.f32.mxu0 %vm1480_vm2, %v941_v49  ;;  %v1156_v63 = vld [vmem:[%s4884_s5 + $0x6b0] sm:$0xff] }
 0x26c   :  { %1691 = vmatmul.mubr.f32.vlgmr.msra.gmra.mrb[10].mxu0 %v940_v54  ;;  %2561 = vmatprep.subr.bf16.mxu1 %v2560_v0  ;;  %v1161_v0 = vld [vmem:[%s4884_s5 + $0x6d8] sm:$0xff]  ;;  %v2594_v40 = vpack.c.bf16 %v1156_v63, %v1152_v61  ;;  %v1228_v61 = vld [vmem:[%s4884_s5 + $0x8f0] sm:$0xff] }
 0x26d   :  { %v2596_v46 = vpack.c.bf16 %v1165_v43, %v1161_v0  ;;  %v1233_v63 = vld [vmem:[%s4884_s5 + $0x918] sm:$0xff] }
 0x26e   :  { %v1237_v0 = vld [vmem:[%s4884_s5 + $0x938] sm:$0xff] }
 0x26f   :  { %2563 = vmatpush1.bf16.msra.mxu1 %v2562_v1  ;;  %v1164_v1 = vld [vmem:[%s4884_s5 + $0x6f0] sm:$0xff] }
 0x270   :  { %2565 = vmatprep.subr.bf16.mxu1 %v2564_v2  ;;  %v1169_v2 = vld [vmem:[%s4884_s5 + $0x718] sm:$0xff]  ;;  %v2598_v5 = vpack.c.bf16 %v1164_v1, %v1160_v52  ;;  %v1236_v52 = vld [vmem:[%s4884_s5 + $0x930] sm:$0xff] }
 0x271   :  { %v2600_v6 = vpack.c.bf16 %v1173_v4, %v1169_v2  ;;  %v1241_v1 = vld [vmem:[%s4884_s5 + $0x958] sm:$0xff] }
 0x272   :  { %v1245_v2 = vld [vmem:[%s4884_s5 + $0x978] sm:$0xff] }
 0x273   :  { %2567 = vmatpush1.bf16.msra.mxu1 %v2566_v9  ;;  %v1172_v9 = vld [vmem:[%s4884_s5 + $0x730] sm:$0xff] }
 0x274   :  { %2569 = vmatprep.subr.bf16.mxu1 %v2568_v12  ;;  %v1177_v12 = vld [vmem:[%s4884_s5 + $0x758] sm:$0xff]  ;;  %v2602_v16 = vpack.c.bf16 %v1172_v9, %v1168_v7  ;;  %v1244_v7 = vld [vmem:[%s4884_s5 + $0x970] sm:$0xff] }
 0x275   :  { %v2604_v17 = vpack.c.bf16 %v1181_v15, %v1177_v12  ;;  %v1249_v9 = vld [vmem:[%s4884_s5 + $0x998] sm:$0xff] }
 0x276   :  { %v1253_v12 = vld [vmem:[%s4884_s5 + $0x9b8] sm:$0xff] }
 0x277   :  { %2571 = vmatpush1.bf16.msra.mxu1 %v2570_v19  ;;  %v1180_v19 = vld [vmem:[%s4884_s5 + $0x770] sm:$0xff] }
 0x278   :  { %2573 = vmatprep.subr.bf16.mxu1 %v2572_v20  ;;  %v1185_v20 = vld [vmem:[%s4884_s5 + $0x798] sm:$0xff]  ;;  %v2606_v27 = vpack.c.bf16 %v1180_v19, %v1176_v18  ;;  %v2640_v19 = vpack.c.bf16 %v1253_v12, %v1249_v9 }
 0x279   :  { %v2608_v22 = vpack.c.bf16 %v1189_v21, %v1185_v20  ;;  %v1248_v20 = vld [vmem:[%s4884_s5 + $0x990] sm:$0xff] }
 0x27a   :  { %v1252_v21 = vld [vmem:[%s4884_s5 + $0x9b0] sm:$0xff] }
 0x27b   :  { %2575 = vmatpush1.bf16.msra.mxu1 %v2574_v24  ;;  %v1188_v24 = vld [vmem:[%s4884_s5 + $0x7b0] sm:$0xff] }
 0x27c   :  { %2577 = vmatprep.subr.bf16.mxu1 %v2576_v25  ;;  %v1193_v25 = vld [vmem:[%s4884_s5 + $0x7d8] sm:$0xff]  ;;  %v2610_v28 = vpack.c.bf16 %v1188_v24, %v1184_v23  ;;  %v2642_v23 = vpack.c.bf16 %v1252_v21, %v1248_v20 }
 0x27d   :  { %v2612_v29 = vpack.c.bf16 %v1197_v26, %v1193_v25  ;;  %v1256_v25 = vld [vmem:[%s4884_s5 + $0x9d0] sm:$0xff] }
 0x27f   :  { %2579 = vmatpush1.bf16.msra.mxu1 %v2578_v47  ;;  %v1196_v47 = vld [vmem:[%s4884_s5 + $0x7f0] sm:$0xff] }
 0x280   :  { %2581 = vmatprep.subr.bf16.mxu1 %v2580_v31  ;;  %v1201_v31 = vld [vmem:[%s4884_s5 + $0x818] sm:$0xff]  ;;  %v2614_v38 = vpack.c.bf16 %v1196_v47, %v1192_v30 }
 0x281   :  { %v2616_v39 = vpack.c.bf16 %v1205_v32, %v1201_v31 }
 0x283   :  { %2583 = vmatpush1.bf16.msra.mxu1 %v2582_v42  ;;  %v1204_v42 = vld [vmem:[%s4884_s5 + $0x830] sm:$0xff] }
 0x284   :  { %2585 = vmatprep.subr.bf16.mxu1 %v2584_v51  ;;  %v1209_v51 = vld [vmem:[%s4884_s5 + $0x858] sm:$0xff]  ;;  %v2618_v48 = vpack.c.bf16 %v1204_v42, %v1200_v41 }
 0x285   :  { %v2620_v50 = vpack.c.bf16 %v1213_v44, %v1209_v51 }
 0x287   :  { %2587 = vmatpush1.bf16.msra.mxu1 %v2586_v3  ;;  %v1212_v3 = vld [vmem:[%s4884_s5 + $0x870] sm:$0xff] }
 0x288   :  { %2589 = vmatprep.subr.bf16.mxu1 %v2588_v34  ;;  %v1217_v34 = vld [vmem:[%s4884_s5 + $0x898] sm:$0xff]  ;;  %v2622_v57 = vpack.c.bf16 %v1212_v3, %v1208_v53 }
 0x289   :  { %v2624_v36 = vpack.c.bf16 %v1221_v56, %v1217_v34  ;;  %v2678_v34 = vmov 1983009808  }
 0x28a   :  { %v1947_v56 = vunpack.c.l.s4 %v2678_v34 }
 0x28b   :  { %2591 = vmatpush1.bf16.msra.mxu1 %v2590_v59  ;;  %v1220_v59 = vld [vmem:[%s4884_s5 + $0x8b0] sm:$0xff] }
 0x28c   :  { %2593 = vmatprep.subr.bf16.mxu1 %v2592_v35  ;;  %v2626_v62 = vpack.c.bf16 %v1220_v59, %v1216_v58  ;;  %v1224_v35 = vld [vmem:[%s4884_s5 + $0x8d0] sm:$0xff]  ;;  %v1948_v58 = vunpack.c.0.s8 %v1947_v56 }
 0x28d   :  { %v2630_v43 = vpack.c.bf16 %v1228_v61, %v1224_v35 }
 0x28f   :  { %2595 = vmatpush1.bf16.msra.mxu1 %v2594_v40  ;;  %v2632_v40 = vpack.c.bf16 %v1237_v0, %v1233_v63 }
 0x290   :  { %2597 = vmatprep.subr.bf16.mxu1 %v2596_v46  ;;  %v1232_v46 = vld [vmem:[%s4884_s5 + $0x910] sm:$0xff] }
 0x291   :  { %v2634_v4 = vpack.c.bf16 %v1236_v52, %v1232_v46 }
 0x293   :  { %2599 = vmatpush1.bf16.msra.mxu1 %v2598_v5  ;;  %v2636_v5 = vpack.c.bf16 %v1245_v2, %v1241_v1 }
 0x294   :  { %2601 = vmatprep.subr.bf16.mxu1 %v2600_v6  ;;  %v1240_v6 = vld [vmem:[%s4884_s5 + $0x950] sm:$0xff] }
 0x297   :  { %2603 = vmatpush1.bf16.msra.mxu1 %v2602_v16  ;;  %v2638_v16 = vpack.c.bf16 %v1244_v7, %v1240_v6 }
 0x298   :  { %2605 = vmatprep.subr.bf16.mxu1 %v2604_v17 }
 0x29b   :  { %2607 = vmatpush1.bf16.msra.mxu1 %v2606_v27 }
 0x29c   :  { %2609 = vmatprep.subr.bf16.mxu1 %v2608_v22  ;;  %v1257_v22 = vld [vmem:[%s4884_s5 + $0x9d8] sm:$0xff] }
 0x29f   :  { %2611 = vmatpush1.bf16.msra.mxu1 %v2610_v28  ;;  %v1265_v28 = vld [vmem:[%s4884_s5 + $0xa18] sm:$0xff] }
 0x2a0   :  { %2613 = vmatprep.subr.bf16.mxu1 %v2612_v29  ;;  %v1264_v29 = vld [vmem:[%s4884_s5 + $0xa10] sm:$0xff] }
 0x2a3   :  { %2615 = vmatpush1.bf16.msra.mxu1 %v2614_v38  ;;  %v1910_v38 = vld [vmem:[%s4886_s7] sm:$0xf] }
 0x2a4   :  { %2617 = vmatprep.subr.bf16.mxu1 %v2616_v39  ;;  %v1915_v39 = vrot.slane %v1910_v38, %v3136_v11  ;;  %v1919_v42 = vrot.slane %v1910_v38, %v3142_v13 }
 0x2a6   :  { %1833 = vmatmul.mubr.f32.vlgmr.msra.gmra.mrb[6].mxu1 %v938_v55  ;;  %v1229_v55 = vld [vmem:[%s4884_s5 + $0x8f8] sm:$0xff] }
 0x2a7   :  { %2619 = vmatpush1.bf16.msra.mxu1 %v2618_v48  ;;  %1976 = vmatprep.mubr.msk.f32.mxu1 %vm1480_vm2, %v941_v49  ;;  %v2628_v49 = vpack.c.bf16 %v1229_v55, %v1225_v45 }
 0x2a8   :  { %2621 = vmatprep.subr.bf16.mxu1 %v2620_v50 }
 0x2ab   :  { %2623 = vmatpush1.bf16.msra.mxu1 %v2622_v57  ;;  %v1923_v57 = vrot.slane %v1910_v38, %v3145_v14 }
 0x2ac   :  { %2625 = vmatprep.subr.bf16.mxu1 %v2624_v36  ;;  %v1927_v36 = vrot.slane %v1910_v38, %v490_v37 }
 0x2af   :  { %2627 = vmatpush1.bf16.msra.mxu1 %v2626_v62  ;;  %v1951_v62 = vsub.s32 %v1948_v58, %v3133_v10 }
 0x2b0   :  { %2629 = vmatprep.subr.bf16.mxu1 %v2628_v49 }
 0x2b3   :  { %2631 = vmatpush1.bf16.msra.mxu1 %v2630_v43 }
 0x2b4   :  { %2633 = vmatprep.subr.bf16.mxu1 %v2632_v40 }
 0x2b7   :  { %2635 = vmatpush1.bf16.msra.mxu1 %v2634_v4  ;;  %v1550_v15 = vpop.f32.mrb[8].mxu0 }
 0x2b8   :  { %v1551_v17 = vadd.f32 %v1550_v15, %v4335_v8  ;;  %v1552_v18 = vpop.f32.mrb[9].mxu0  ;;  %2637 = vmatprep.subr.bf16.mxu1 %v2636_v5  ;;  %v1261_v8 = vld [vmem:[%s4884_s5 + $0x9f8] sm:$0xff] }
 0x2b9   :  { %v1553_v27 = vadd.f32 %v1552_v18, %v4337_v33  ;;  %v2644_v24 = vpack.c.bf16 %v1261_v8, %v1257_v22  ;;  %v1260_v33 = vld [vmem:[%s4884_s5 + $0x9f0] sm:$0xff] }
 0x2ba   :  { %v2646_v26 = vpack.c.bf16 %v1260_v33, %v1256_v25 }
 0x2bb   :  { %2639 = vmatpush1.bf16.msra.mxu1 %v2638_v16 }
 0x2bc   :  { %2641 = vmatprep.subr.bf16.mxu1 %v2640_v19 }
 0x2bf   :  { %2643 = vmatpush1.bf16.msra.mxu1 %v2642_v23 }
 0x2c0   :  { %2645 = vmatprep.subr.bf16.mxu1 %v2644_v24 }
 0x2c3   :  { %2647 = vmatpush1.bf16.msra.mxu1 %v2646_v26 }
 0x2c4   :  { %1871 = vmatprep.subr.mxu1 %v1265_v28 }
 0x2c7   :  { %1872 = vmatpush1.msra.mxu1 %v1264_v29 }
 0x2c8   :  { %1904 = vmatmul.mubr.f32.vlgmr.msra.gmra.mrb[6].mxu1 %v940_v54 }
 0x2f9   :  { %v1621_v30 = vpop.f32.mrb[8].mxu1 }
 0x2fa   :  { %v1622_v47 = vadd.f32 %v1621_v30, %v1551_v17  ;;  %v1623_v31 = vpop.f32.mrb[9].mxu1 }
 0x2fb   :  { %v1624_v32 = vadd.f32 %v1623_v31, %v1553_v27 }
 0x33f   :  { %v1692_v41 = vpop.f32.mrb[10].mxu0 }
 0x340   :  { %v1693_v51 = vadd.f32 %v1692_v41, %v1622_v47  ;;  %v1694_v44 = vpop.f32.mrb[11].mxu0 }
 0x341   :  { %v1695_v48 = vadd.f32 %v1694_v44, %v1624_v32 }
 0x342   :  { %v1932_v50 = vadd.f32 %v1915_v39, %v1693_v51 }
 0x343   :  { %v1933_v53 = vadd.f32 %v1919_v42, %v1695_v48 }
 0x344   :  { %v1936_v60 = vmax.f32 %v1932_v50, 0.0 }
 0x345   :  { %v1937_v54 = vmax.f32 %v1933_v53, 0.0 }
 0x347   :  { %v1944_v3 = vcombine.low %v1936_v60, %v1937_v54 }
 0x349   :  { %v1952_v61 = vrot.slane %v1944_v3, %v1951_v62 }
 0x39b   :  { %v1905_v11 = vpop.f32.mrb[6].mxu1 }
 0x39c   :  { %v1934_v59 = vadd.f32 %v1923_v57, %v1905_v11  ;;  %v1907_v45 = vpop.f32.mrb[7].mxu1 }
 0x39d   :  { %v1935_v13 = vadd.f32 %v1927_v36, %v1907_v45 }
 0x39e   :  { %v1938_v55 = vmax.f32 %v1934_v59, 0.0 }
 0x39f   :  { %v1939_v49 = vmax.f32 %v1935_v13, 0.0 }
 0x3a1   :  { %v1945_v35 = vcombine.low %v1938_v55, %v1939_v49 }
 0x3a3   :  { %v1959_v63 = vrot.slane %v1945_v35, %v1951_v62 }
 0x3a5   :  { %v1960_v0 = vcombine.low %v1952_v61, %v1959_v63 }
 0x3a7   :  { %1962 = vst [vmem:[%s4887_s8] sm:$0xff] %v1960_v0 }

</bundles_post_ra>
